<compile_context>
chip_gen: v7x
topology: tpu7x:2x2x1
jax: 0.10.0
libtpu: 0.0.40
codegen_flags: <defaults>
</compile_context>

<pallas_src>
import jax
import jax.numpy as jnp
import numpy as np
from jax import lax
from jax.experimental import pallas as pl
from jax.experimental.pallas import tpu as pltpu

VOCAB = 100
EMBED = 32
HIDDEN = 128
VOCAB_PAD = 128   # vocab padded to one MXU lane tile


def lstm_kernel(tok_ref, proj_ref, whh_ref, wout_ref, bout_ref, o_ref, h_ref, c_ref):
    """Full LSTM recurrence for one batch tile (transposed layout).

    tok_ref:  [T, TB]       int32    tokens (time-major)
    proj_ref: [4H, VP]      bf16     W_ih @ E^T + (b_ih + b_hh), vocab padded to 128
    whh_ref:  [4H, H]       bf16     hidden->gates weights (PyTorch layout)
    wout_ref: [H, 1]        f32      hidden2tag weight (column vector)
    bout_ref: [1]           f32      hidden2tag bias (SMEM scalar)
    o_ref:    [1, TB]       f32      sigmoid(tag_space) for this batch tile
    h_ref:    [H, TB]       f32      VMEM scratch, hidden state (transposed)
    c_ref:    [H, TB]       f32      VMEM scratch, cell state   (transposed)
    """
    T = tok_ref.shape[0]
    TB = tok_ref.shape[1]
    VP = proj_ref.shape[1]
    H = whh_ref.shape[1]

    h_ref[...] = jnp.zeros_like(h_ref)
    c_ref[...] = jnp.zeros_like(c_ref)

    # Loop-invariant vocab iota for the one-hot gather (hoisted: JAX does not CSE
    # broadcast_in_dim).
    vocab_iota = lax.broadcasted_iota(jnp.int32, (VP, TB), 0)

    @pl.loop(0, T)
    def _step(t):
        # --- input gates via one-hot gather from the VMEM-resident proj table ----
        tok = tok_ref[pl.ds(t, 1), :]                              # [1, TB] int32
        one_hot = (vocab_iota == tok).astype(proj_ref.dtype)       # [VP, TB] bf16
        gx = jnp.dot(proj_ref[...], one_hot,
                     preferred_element_type=jnp.float32)           # [4H, TB]

        # --- recurrent projection: gates^T = W_hh @ h^T (bf16 MXU, f32 acc) ------
        gh = jnp.dot(whh_ref[...], h_ref[...].astype(whh_ref.dtype),
                     preferred_element_type=jnp.float32)           # [4H, TB]
        gates = gx + gh

        # Gate order in PyTorch nn.LSTM: i, f, g, o (static sublane slices).
        i_g = jax.nn.sigmoid(gates[0:H])
        f_g = jax.nn.sigmoid(gates[H:2 * H])
        g_g = jnp.tanh(gates[2 * H:3 * H])
        o_g = jax.nn.sigmoid(gates[3 * H:4 * H])

        c_new = f_g * c_ref[...] + i_g * g_g
        h_ref[...] = o_g * jnp.tanh(c_new)
        c_ref[...] = c_new

    # Epilogue: hidden2tag on the last hidden state.  Output dim is 1, so do an
    # elementwise multiply + sublane reduce (XLU) instead of a degenerate matmul.
    logits = jnp.sum(h_ref[...] * wout_ref[...], axis=0, keepdims=True) + bout_ref[0]
    o_ref[...] = jax.nn.sigmoid(logits)                             # [1, TB]


def lstm_detector(tokens, params):
    """tokens: [B, T] int32.  Returns [B, 1] float32 probabilities."""
    B, T = tokens.shape
    H = HIDDEN
    VP = VOCAB_PAD

    # ---- wrapper glue (plain JAX, all tiny) ----------------------------------
    # Fuse embedding + input projection + combined bias (transposed):
    #   proj_T[:, v] = W_ih @ embedding[v] + (b_ih + b_hh)      -> [4H, VOCAB]
    wih = params["w_ih"].astype(jnp.float32)                        # [4H, E]
    b = (params["b_ih"] + params["b_hh"]).astype(jnp.float32)       # [4H]
    proj_T = wih @ params["embedding"].astype(jnp.float32).T + b[:, None]
    if VOCAB < VP:
        proj_T = jnp.pad(proj_T, ((0, 0), (0, VP - VOCAB)))
    proj_T = proj_T.astype(jnp.bfloat16)                            # [4H, VP]

    whh = params["w_hh"].astype(jnp.bfloat16)                       # [4H, H]
    wout = params["w_out"].reshape(H, 1).astype(jnp.float32)        # [H, 1]
    bout = params["b_out"].reshape(1).astype(jnp.float32)           # [1] (SMEM)

    # Batch tiling: TB=128 when B is large (nb >= 2 above 128 -> both v7x TCs),
    # else pad to a sublane-aligned tile.
    TB = 128 if B >= 128 else (-(-B // 8) * 8)
    B_pad = -(-B // TB) * TB
    nb = B_pad // TB

    tok_T = tokens.astype(jnp.int32).T                               # [T, B]
    if B_pad != B:
        tok_T = jnp.pad(tok_T, ((0, 0), (0, B_pad - B)))             # pad cols w/ token 0

    out = pl.pallas_call(
        lstm_kernel,
        out_shape=jax.ShapeDtypeStruct((1, B_pad), jnp.float32),
        grid=(nb,),
        in_specs=[
            pl.BlockSpec((T, TB), lambda bb: (0, bb)),               # tokens
            pl.BlockSpec((4 * H, VP), lambda bb: (0, 0)),            # proj_T (VMEM resident)
            pl.BlockSpec((4 * H, H), lambda bb: (0, 0)),             # W_hh
            pl.BlockSpec((H, 1), lambda bb: (0, 0)),                 # w_out
            pl.BlockSpec(memory_space=pltpu.MemorySpace.SMEM),       # b_out scalar
        ],
        out_specs=pl.BlockSpec((1, TB), lambda bb: (0, bb)),
        scratch_shapes=[
            pltpu.VMEM((H, TB), jnp.float32),                        # h^T
            pltpu.VMEM((H, TB), jnp.float32),                        # c^T
        ],
        compiler_params=pltpu.CompilerParams(
            dimension_semantics=("parallel",),
        ),
    )(tok_T, proj_T, whh, wout, bout)

    return out[0, :B].reshape(B, 1)


def reference_forward(tokens, params):
    """Pure-JAX f32 reference of the PyTorch forward (for correctness check)."""
    x = jnp.take(params["embedding"], tokens, axis=0).astype(jnp.float32)  # [B,T,E]
    B, T, _ = x.shape
    H = HIDDEN
    wih = params["w_ih"].astype(jnp.float32)   # [4H, E]
    whh = params["w_hh"].astype(jnp.float32)   # [4H, H]
    b = (params["b_ih"] + params["b_hh"]).astype(jnp.float32)

    def step(carry, x_t):
        h, c = carry
        gates = x_t @ wih.T + h @ whh.T + b
        i = jax.nn.sigmoid(gates[:, 0:H])
        f = jax.nn.sigmoid(gates[:, H:2 * H])
        g = jnp.tanh(gates[:, 2 * H:3 * H])
        o = jax.nn.sigmoid(gates[:, 3 * H:4 * H])
        c = f * c + i * g
        h = o * jnp.tanh(c)
        return (h, c), None

    h0 = jnp.zeros((B, H), jnp.float32)
    c0 = jnp.zeros((B, H), jnp.float32)
    (h_last, _), _ = lax.scan(step, (h0, c0), jnp.transpose(x, (1, 0, 2)))
    logits = h_last @ params["w_out"].astype(jnp.float32).T + params["b_out"]
    return jax.nn.sigmoid(logits)


def init_params(key):
    ks = jax.random.split(key, 7)
    k_lstm = 1.0 / jnp.sqrt(HIDDEN)
    return {
        "embedding": jax.random.normal(ks[0], (VOCAB, EMBED), jnp.float32),
        "w_ih": jax.random.uniform(ks[1], (4 * HIDDEN, EMBED), jnp.float32, -k_lstm, k_lstm),
        "w_hh": jax.random.uniform(ks[2], (4 * HIDDEN, HIDDEN), jnp.float32, -k_lstm, k_lstm),
        "b_ih": jax.random.uniform(ks[3], (4 * HIDDEN,), jnp.float32, -k_lstm, k_lstm),
        "b_hh": jax.random.uniform(ks[4], (4 * HIDDEN,), jnp.float32, -k_lstm, k_lstm),
        "w_out": jax.random.uniform(ks[5], (1, HIDDEN), jnp.float32, -k_lstm, k_lstm),
        "b_out": jax.random.uniform(ks[6], (1,), jnp.float32, -k_lstm, k_lstm),
    }


if __name__ == "__main__":
    key = jax.random.PRNGKey(0)
    k_tok, k_par = jax.random.split(key)

    B, T = 2, 8
    tokens = jax.random.randint(k_tok, (B, T), 0, VOCAB, dtype=jnp.int32)
    params = init_params(k_par)

    out = lstm_detector(tokens, params)
    out = jax.block_until_ready(out)

    ref = jax.block_until_ready(reference_forward(tokens, params))
    # Tolerance accounts for bf16 MXU operands (f32 accumulation) over the
    # 8-step recurrence; a pure-f32 kernel matches to <1e-3.
    np.testing.assert_allclose(np.asarray(out), np.asarray(ref), rtol=5e-3, atol=5e-3)

    assert out.shape == (B, 1) and out.dtype == jnp.float32
    print("KERNEL_OK")
</pallas_src>

<mosaic_0001>
module attributes {stable_mosaic.version = 11 : i64} {
  func.func @lstm_kernel(%arg0: i32, %arg1: memref<8x8xi32, #tpu.memory_space<vmem>>, %arg2: memref<512x128xbf16, #tpu.memory_space<vmem>>, %arg3: memref<512x128xbf16, #tpu.memory_space<vmem>>, %arg4: memref<128x1xf32, #tpu.memory_space<vmem>>, %arg5: memref<1xf32, #tpu.memory_space<smem>>, %arg6: memref<1x8xf32, #tpu.memory_space<vmem>>, %arg7: memref<128x8xf32, #tpu.memory_space<vmem>>, %arg8: memref<128x8xf32, #tpu.memory_space<vmem>>) attributes {dimension_semantics = [#tpu.dimension_semantics<parallel>], iteration_bounds = array<i64: 1>, scalar_prefetch = 0 : i64, scratch_operands = 2 : i64, tpu.core_type = #tpu.core_type<tc>, window_params = [{transform_indices = @transform_0, window_bounds = array<i64: 8, 8>}, {pipeline_mode = #tpu.pipeline_mode<synchronous>, transform_indices = @transform_1, window_bounds = array<i64: 512, 128>}, {pipeline_mode = #tpu.pipeline_mode<synchronous>, transform_indices = @transform_2, window_bounds = array<i64: 512, 128>}, {pipeline_mode = #tpu.pipeline_mode<synchronous>, transform_indices = @transform_3, window_bounds = array<i64: 128, 1>}, {transform_indices = @transform_4, window_bounds = array<i64: 1>}, {transform_indices = @transform_5, window_bounds = array<i64: 1, 8>}]} {
    %cst = arith.constant 0.000000e+00 : f32
    %0 = vector.broadcast %cst : f32 to vector<128x8xf32>
    %c0 = arith.constant 0 : index
    %c0_0 = arith.constant 0 : index
    %1 = vector.load %arg7[%c0, %c0_0] : memref<128x8xf32, #tpu.memory_space<vmem>>, vector<128x8xf32>
    tpu.vector_store %arg7[%c0, %c0_0], %0 {strides = array<i32>} : memref<128x8xf32, #tpu.memory_space<vmem>>, vector<128x8xf32>,
    %cst_1 = arith.constant 0.000000e+00 : f32
    %2 = vector.broadcast %cst_1 : f32 to vector<128x8xf32>
    %c0_2 = arith.constant 0 : index
    %c0_3 = arith.constant 0 : index
    %3 = vector.load %arg8[%c0_2, %c0_3] : memref<128x8xf32, #tpu.memory_space<vmem>>, vector<128x8xf32>
    tpu.vector_store %arg8[%c0_2, %c0_3], %2 {strides = array<i32>} : memref<128x8xf32, #tpu.memory_space<vmem>>, vector<128x8xf32>,
    %4 = tpu.iota {dimensions = array<i32: 0>} : vector<128x8xi32>
    %c0_i32 = arith.constant 0 : i32
    %c8_i32 = arith.constant 8 : i32
    %5 = arith.addi %c0_i32, %c8_i32 : i32
    %c1_i32 = arith.constant 1 : i32
    scf.for %arg9 = %c0_i32 to %5 step %c1_i32  : i32 {
      %c1_i32_14 = arith.constant 1 : i32
      %21 = arith.muli %arg9, %c1_i32_14 : i32
      %c0_i32_15 = arith.constant 0 : i32
      %22 = arith.addi %c0_i32_15, %21 : i32
      %23 = arith.index_cast %22 : i32 to index
      %c0_16 = arith.constant 0 : index
      %24 = vector.load %arg1[%23, %c0_16] : memref<8x8xi32, #tpu.memory_space<vmem>>, vector<1x8xi32>
      %25 = vector.broadcast %24 : vector<1x8xi32> to vector<128x8xi32>
      %26 = arith.cmpi eq, %4, %25 : vector<128x8xi32>
      %27 = arith.extui %26 : vector<128x8xi1> to vector<128x8xi32>
      %28 = arith.sitofp %27 : vector<128x8xi32> to vector<128x8xf32>
      %29 = arith.truncf %28 : vector<128x8xf32> to vector<128x8xbf16>
      %c0_17 = arith.constant 0 : index
      %c0_18 = arith.constant 0 : index
      %30 = vector.load %arg2[%c0_17, %c0_18] : memref<512x128xbf16, #tpu.memory_space<vmem>>, vector<512x128xbf16>
      %cst_19 = arith.constant dense<0.000000e+00> : vector<512x8xf32>
      %31 = tpu.matmul %30, %29, %cst_19 {dimension_numbers = #tpu.dot_dimension_numbers<[1], [0], [0], [1], [0, 0, 1, 1], [], []>} : vector<512x128xbf16>, vector<128x8xbf16>, vector<512x8xf32> -> vector<512x8xf32>
      %c0_20 = arith.constant 0 : index
      %c0_21 = arith.constant 0 : index
      %32 = vector.load %arg3[%c0_20, %c0_21] : memref<512x128xbf16, #tpu.memory_space<vmem>>, vector<512x128xbf16>
      %c0_22 = arith.constant 0 : index
      %c0_23 = arith.constant 0 : index
      %33 = vector.load %arg7[%c0_22, %c0_23] : memref<128x8xf32, #tpu.memory_space<vmem>>, vector<128x8xf32>
      %34 = arith.truncf %33 : vector<128x8xf32> to vector<128x8xbf16>
      %cst_24 = arith.constant dense<0.000000e+00> : vector<512x8xf32>
      %35 = tpu.matmul %32, %34, %cst_24 {dimension_numbers = #tpu.dot_dimension_numbers<[1], [0], [0], [1], [0, 0, 1, 1], [], []>} : vector<512x128xbf16>, vector<128x8xbf16>, vector<512x8xf32> -> vector<512x8xf32>
      %36 = arith.addf %31, %35 : vector<512x8xf32>
      %37 = vector.extract_strided_slice %36 {offsets = [0, 0], sizes = [128, 8], strides = [1, 1]} : vector<512x8xf32> to vector<128x8xf32>
      %38 = arith.negf %37 : vector<128x8xf32>
      %39 = math.exp %38 : vector<128x8xf32>
      %cst_25 = arith.constant 1.000000e+00 : f32
      %40 = vector.broadcast %cst_25 : f32 to vector<128x8xf32>
      %41 = arith.addf %40, %39 : vector<128x8xf32>
      %42 = arith.divf %40, %41 : vector<128x8xf32>
      %43 = vector.extract_strided_slice %36 {offsets = [128, 0], sizes = [128, 8], strides = [1, 1]} : vector<512x8xf32> to vector<128x8xf32>
      %44 = arith.negf %43 : vector<128x8xf32>
      %45 = math.exp %44 : vector<128x8xf32>
      %cst_26 = arith.constant 1.000000e+00 : f32
      %46 = vector.broadcast %cst_26 : f32 to vector<128x8xf32>
      %47 = arith.addf %46, %45 : vector<128x8xf32>
      %48 = arith.divf %46, %47 : vector<128x8xf32>
      %49 = vector.extract_strided_slice %36 {offsets = [256, 0], sizes = [128, 8], strides = [1, 1]} : vector<512x8xf32> to vector<128x8xf32>
      %50 = math.tanh %49 : vector<128x8xf32>
      %51 = vector.extract_strided_slice %36 {offsets = [384, 0], sizes = [128, 8], strides = [1, 1]} : vector<512x8xf32> to vector<128x8xf32>
      %52 = arith.negf %51 : vector<128x8xf32>
      %53 = math.exp %52 : vector<128x8xf32>
      %cst_27 = arith.constant 1.000000e+00 : f32
      %54 = vector.broadcast %cst_27 : f32 to vector<128x8xf32>
      %55 = arith.addf %54, %53 : vector<128x8xf32>
      %56 = arith.divf %54, %55 : vector<128x8xf32>
      %c0_28 = arith.constant 0 : index
      %c0_29 = arith.constant 0 : index
      %57 = vector.load %arg8[%c0_28, %c0_29] : memref<128x8xf32, #tpu.memory_space<vmem>>, vector<128x8xf32>
      %58 = arith.mulf %48, %57 : vector<128x8xf32>
      %59 = arith.mulf %42, %50 : vector<128x8xf32>
      %60 = arith.addf %58, %59 : vector<128x8xf32>
      %61 = math.tanh %60 : vector<128x8xf32>
      %62 = arith.mulf %56, %61 : vector<128x8xf32>
      %c0_30 = arith.constant 0 : index
      %c0_31 = arith.constant 0 : index
      %63 = vector.load %arg7[%c0_30, %c0_31] : memref<128x8xf32, #tpu.memory_space<vmem>>, vector<128x8xf32>
      tpu.vector_store %arg7[%c0_30, %c0_31], %62 {strides = array<i32>} : memref<128x8xf32, #tpu.memory_space<vmem>>, vector<128x8xf32>,
      %c0_32 = arith.constant 0 : index
      %c0_33 = arith.constant 0 : index
      %64 = vector.load %arg8[%c0_32, %c0_33] : memref<128x8xf32, #tpu.memory_space<vmem>>, vector<128x8xf32>
      tpu.vector_store %arg8[%c0_32, %c0_33], %60 {strides = array<i32>} : memref<128x8xf32, #tpu.memory_space<vmem>>, vector<128x8xf32>,
    }
    %c8_i32_4 = arith.constant 8 : i32
    %c0_5 = arith.constant 0 : index
    %c0_6 = arith.constant 0 : index
    %6 = vector.load %arg7[%c0_5, %c0_6] : memref<128x8xf32, #tpu.memory_space<vmem>>, vector<128x8xf32>
    %c0_7 = arith.constant 0 : index
    %c0_8 = arith.constant 0 : index
    %7 = vector.load %arg4[%c0_7, %c0_8] : memref<128x1xf32, #tpu.memory_space<vmem>>, vector<128x1xf32>
    %8 = vector.broadcast %7 : vector<128x1xf32> to vector<128x8xf32>
    %9 = arith.mulf %6, %8 : vector<128x8xf32>
    %cst_9 = arith.constant dense<0.000000e+00> : vector<8xf32>
    %10 = vector.multi_reduction <add>, %9, %cst_9 [0] : vector<128x8xf32> to vector<8xf32>
    %11 = vector.shape_cast %10 : vector<8xf32> to vector<1x8xf32>
    %c0_10 = arith.constant 0 : index
    %12 = memref.load %arg5[%c0_10] : memref<1xf32, #tpu.memory_space<smem>>
    %13 = vector.broadcast %12 : f32 to vector<1x8xf32>
    %14 = arith.addf %11, %13 : vector<1x8xf32>
    %15 = arith.negf %14 : vector<1x8xf32>
    %16 = math.exp %15 : vector<1x8xf32>
    %cst_11 = arith.constant 1.000000e+00 : f32
    %17 = vector.broadcast %cst_11 : f32 to vector<1x8xf32>
    %18 = arith.addf %17, %16 : vector<1x8xf32>
    %19 = arith.divf %17, %18 : vector<1x8xf32>
    %c0_12 = arith.constant 0 : index
    %c0_13 = arith.constant 0 : index
    %20 = vector.load %arg6[%c0_12, %c0_13] : memref<1x8xf32, #tpu.memory_space<vmem>>, vector<1x8xf32>
    tpu.vector_store %arg6[%c0_12, %c0_13], %19 {strides = array<i32>} : memref<1x8xf32, #tpu.memory_space<vmem>>, vector<1x8xf32>,
    return
  }
  func.func @transform_0(%arg0: i32) -> (i32, i32) {
    %c0_i32 = arith.constant 0 : i32
    %c0_i32_0 = arith.constant 0 : i32
    return %c0_i32, %arg0 : i32, i32
  }
  func.func @transform_1(%arg0: i32) -> (i32, i32) {
    %c0_i32 = arith.constant 0 : i32
    %c0_i32_0 = arith.constant 0 : i32
    %c0_i32_1 = arith.constant 0 : i32
    return %c0_i32, %c0_i32_0 : i32, i32
  }
  func.func @transform_2(%arg0: i32) -> (i32, i32) {
    %c0_i32 = arith.constant 0 : i32
    %c0_i32_0 = arith.constant 0 : i32
    %c0_i32_1 = arith.constant 0 : i32
    return %c0_i32, %c0_i32_0 : i32, i32
  }
  func.func @transform_3(%arg0: i32) -> (i32, i32) {
    %c0_i32 = arith.constant 0 : i32
    %c0_i32_0 = arith.constant 0 : i32
    %c0_i32_1 = arith.constant 0 : i32
    return %c0_i32, %c0_i32_0 : i32, i32
  }
  func.func @transform_4(%arg0: i32) -> i32 {
    %c0_i32 = arith.constant 0 : i32
    %c0_i32_0 = arith.constant 0 : i32
    return %c0_i32 : i32
  }
  func.func @transform_5(%arg0: i32) -> (i32, i32) {
    %c0_i32 = arith.constant 0 : i32
    %c0_i32_0 = arith.constant 0 : i32
    return %c0_i32, %arg0 : i32, i32
  }
}

</mosaic_0001>

<bundles_post_ra>
// kernel: tpu_custom_call.1
= control target key start
LH: loop header
LB: loop body
LE: loop exit
PB: predicated region body
PF: predicated region fallthrough
CT: control target
= control target key end

     0   :  { %s3276_s0 = inlined_call_operand.vmem [shape: s32[8,8], index: 0, kind: input, shape index: {}]   ;;  %s3277_s1 = inlined_call_operand.hbm [shape: bf16[512,128], index: 1, kind: input, shape index: {}]   ;;  %s3278_s2 = inlined_call_operand.hbm [shape: bf16[512,128], index: 2, kind: input, shape index: {}]   ;;  %s3279_s3 = inlined_call_operand.vmem [shape: f32[128,1], index: 3, kind: input, shape index: {}]   ;;  %s3280_s4 = inlined_call_operand.<no memory space> [shape: f32[1], index: 4, kind: input, shape index: {}]   ;;  %s3281_s5 = inlined_call_operand.hbm [shape: f32[1,8], index: 5, kind: output, shape index: {}]  }
   0x1   :  { %10 = sst [smem:[#allocation4]] %s3280_s4 }
   0x2   :  { %11 = vsyncpa [#allocation6], 0 }
   0x3   :  { %12 = vsyncpa [#allocation9], 0 }
   0x4   :  { %13 = vsyncpa [#allocation7], 0  ;;  %s2785_s20 = smov [#allocation5]   ;;  %s2705_s24 = scalar_lea.hbm %s3277_s1, 4096 }
   0x5   :  { %s21_s21 = sshll.u32 %s2785_s20, 4  ;;  %p2706_p0 = scmp.ne.s32.totalorder %s3277_s1, %s2705_s24  ;;  %s22_s21 = int_to_ptr.vmem [resolvable:$true] %s21_s21 }
   0x6   :  { %p2709_p1 = scmp.lt.u32.totalorder %s2705_s24, %s3277_s1 }
   0x8   :  { %p2711_p2 = pnand %p2709_p1, %p2706_p0 }
   0xa   :  { %2714 = shalt.err (!%p2711_p2)
}
   0xb   :  { %s2715_s4 = scalar_lea.vmem %s22_s21, 4096  ;;  %p2720_p4 = scmp.lt.s32.totalorder %s22_s21, %s22_s21 }
   0xc   :  { %p2716_p3 = scmp.ne.s32.totalorder %s22_s21, %s2715_s4  ;;  %p2721_p5 = scmp.lt.s32.totalorder %s2715_s4, %s2715_s4 }
   0xe   :  { %p2722_p6 = por %p2721_p5, %p2720_p4 }
  0x10   :  { %p2723_p7 = pnand %p2722_p6, %p2716_p3 }
  0x12   :  { %2726 = shalt.err (!%p2723_p7)
}
  0x13   :  { %s2786_s29 = smov 64   ;;  %s2787_s30 = smov 4  }
  0x14   :  { %27 = dma.hbm_to_vmem [thread:$0]  %s3277_s1, 4096, %s22_s21, [#allocation6], %s2786_s29, %s2786_s29, %s2787_s30  }
  0x15   :  { %s2788_s8 = smov [#allocation8]   ;;  %s2727_s12 = scalar_lea.hbm %s3278_s2, 4096 }
  0x16   :  { %s33_s9 = sshll.u32 %s2788_s8, 4  ;;  %p2728_p8 = scmp.ne.s32.totalorder %s3278_s2, %s2727_s12  ;;  %s34_s9 = int_to_ptr.vmem [resolvable:$true] %s33_s9 }
  0x17   :  { %p2731_p9 = scmp.lt.u32.totalorder %s2727_s12, %s3278_s2 }
  0x19   :  { %p2733_p10 = pnand %p2731_p9, %p2728_p8 }
  0x1b   :  { %2736 = shalt.err (!%p2733_p10)
}
  0x1c   :  { %s2737_s17 = scalar_lea.vmem %s34_s9, 4096  ;;  %p2742_p12 = scmp.lt.s32.totalorder %s34_s9, %s34_s9 }
  0x1d   :  { %p2738_p11 = scmp.ne.s32.totalorder %s34_s9, %s2737_s17  ;;  %p2743_p13 = scmp.lt.s32.totalorder %s2737_s17, %s2737_s17 }
  0x1f   :  { %p2744_p0 = por %p2743_p13, %p2742_p12 }
  0x21   :  { %p2745_p1 = pnand %p2744_p0, %p2738_p11 }
  0x23   :  { %2748 = shalt.err (!%p2745_p1)
}
  0x24   :  { %39 = dma.hbm_to_vmem [thread:$0]  %s3278_s2, 4096, %s34_s9, [#allocation9], %s2786_s29, %s2786_s29, %s2787_s30  }
  0x25   :  { %2775 = dma.done.wait [#allocation6], 4096  }
  0x26   :  { %2776 = vsyncadd [#allocation6], 4294963200 }
  0x27   :  { %2777 = dma.done.wait [#allocation9], 4096  }
  0x28   :  { %2778 = vsyncadd [#allocation9], 4294963200  ;;  %vm51_vm0 = vcmask 64512   ;;  %v84_v0 = vlaneseq  ;;  %v2789_v1 = vmov 0.0   ;;  %s2929_s2 = smov 0  }
  0x29   :  { %52 = vst.msk [vmem:[#allocation2] sm:$0xff] %vm51_vm0, %v2789_v1  ;;  %53 = vst.msk [vmem:[#allocation2 + $0x8] sm:$0xff] %vm51_vm0, %v2789_v1 }
  0x2a   :  { %54 = vst.msk [vmem:[#allocation2 + $0x10] sm:$0xff] %vm51_vm0, %v2789_v1  ;;  %55 = vst.msk [vmem:[#allocation2 + $0x18] sm:$0xff] %vm51_vm0, %v2789_v1  ;;  %v2882_v2 = vshrl.u32 %v84_v0, 7 }
  0x2b   :  { %56 = vst.msk [vmem:[#allocation2 + $0x20] sm:$0xff] %vm51_vm0, %v2789_v1  ;;  %57 = vst.msk [vmem:[#allocation2 + $0x28] sm:$0xff] %vm51_vm0, %v2789_v1 }
  0x2c   :  { %58 = vst.msk [vmem:[#allocation2 + $0x30] sm:$0xff] %vm51_vm0, %v2789_v1  ;;  %59 = vst.msk [vmem:[#allocation2 + $0x38] sm:$0xff] %vm51_vm0, %v2789_v1  ;;  %v2885_v3 = vadd.s32 8, %v2882_v2  ;;  %v2888_v4 = vadd.s32 16, %v2882_v2  ;;  %v2891_v5 = vadd.s32 24, %v2882_v2  ;;  %v2894_v6 = vadd.s32 32, %v2882_v2 }
  0x2d   :  { %60 = vst.msk [vmem:[#allocation2 + $0x40] sm:$0xff] %vm51_vm0, %v2789_v1  ;;  %61 = vst.msk [vmem:[#allocation2 + $0x48] sm:$0xff] %vm51_vm0, %v2789_v1  ;;  %v2897_v7 = vadd.s32 40, %v2882_v2  ;;  %v2900_v8 = vadd.s32 48, %v2882_v2  ;;  %v2903_v9 = vadd.s32 56, %v2882_v2  ;;  %v2906_v10 = vadd.s32 64, %v2882_v2 }
  0x2e   :  { %62 = vst.msk [vmem:[#allocation2 + $0x50] sm:$0xff] %vm51_vm0, %v2789_v1  ;;  %63 = vst.msk [vmem:[#allocation2 + $0x58] sm:$0xff] %vm51_vm0, %v2789_v1  ;;  %v2909_v11 = vadd.s32 72, %v2882_v2  ;;  %v2912_v12 = vadd.s32 80, %v2882_v2  ;;  %v2915_v13 = vadd.s32 88, %v2882_v2  ;;  %v2918_v14 = vadd.s32 96, %v2882_v2 }
  0x2f   :  { %64 = vst.msk [vmem:[#allocation2 + $0x60] sm:$0xff] %vm51_vm0, %v2789_v1  ;;  %65 = vst.msk [vmem:[#allocation2 + $0x68] sm:$0xff] %vm51_vm0, %v2789_v1  ;;  %v2921_v15 = vadd.s32 104, %v2882_v2  ;;  %v2924_v16 = vadd.s32 112, %v2882_v2  ;;  %v2927_v17 = vadd.s32 120, %v2882_v2 }
  0x30   :  { %66 = vst.msk [vmem:[#allocation2 + $0x70] sm:$0xff] %vm51_vm0, %v2789_v1  ;;  %67 = vst.msk [vmem:[#allocation2 + $0x78] sm:$0xff] %vm51_vm0, %v2789_v1 }
  0x31   :  { %68 = vst.msk [vmem:[#allocation3] sm:$0xff] %vm51_vm0, %v2789_v1  ;;  %69 = vst.msk [vmem:[#allocation3 + $0x8] sm:$0xff] %vm51_vm0, %v2789_v1 }
  0x32   :  { %70 = vst.msk [vmem:[#allocation3 + $0x10] sm:$0xff] %vm51_vm0, %v2789_v1  ;;  %71 = vst.msk [vmem:[#allocation3 + $0x18] sm:$0xff] %vm51_vm0, %v2789_v1 }
  0x33   :  { %72 = vst.msk [vmem:[#allocation3 + $0x20] sm:$0xff] %vm51_vm0, %v2789_v1  ;;  %73 = vst.msk [vmem:[#allocation3 + $0x28] sm:$0xff] %vm51_vm0, %v2789_v1 }
  0x34   :  { %74 = vst.msk [vmem:[#allocation3 + $0x30] sm:$0xff] %vm51_vm0, %v2789_v1  ;;  %75 = vst.msk [vmem:[#allocation3 + $0x38] sm:$0xff] %vm51_vm0, %v2789_v1 }
  0x35   :  { %76 = vst.msk [vmem:[#allocation3 + $0x40] sm:$0xff] %vm51_vm0, %v2789_v1  ;;  %77 = vst.msk [vmem:[#allocation3 + $0x48] sm:$0xff] %vm51_vm0, %v2789_v1 }
  0x36   :  { %78 = vst.msk [vmem:[#allocation3 + $0x50] sm:$0xff] %vm51_vm0, %v2789_v1  ;;  %79 = vst.msk [vmem:[#allocation3 + $0x58] sm:$0xff] %vm51_vm0, %v2789_v1 }
  0x37   :  { %80 = vst.msk [vmem:[#allocation3 + $0x60] sm:$0xff] %vm51_vm0, %v2789_v1  ;;  %81 = vst.msk [vmem:[#allocation3 + $0x68] sm:$0xff] %vm51_vm0, %v2789_v1 }
  0x38   :  { %82 = vst.msk [vmem:[#allocation3 + $0x70] sm:$0xff] %vm51_vm0, %v2789_v1  ;;  %83 = vst.msk [vmem:[#allocation3 + $0x78] sm:$0xff] %vm51_vm0, %v2789_v1 }
  0x39   :  { %3283 = vst [vmem:[#allocation14_spill] sm:$0xff] %v2882_v2  ;;  %3284 = vst [vmem:[#allocation15_spill] sm:$0xff] %v2885_v3 }
  0x3a LB: > { %v297_v18 = vld [vmem:[#allocation2] sm:$0xff]  ;;  %v298_v19 = vld [vmem:[#allocation2 + $0x8] sm:$0xff]  ;;  %v299_v20 = vld [vmem:[#allocation2 + $0x10] sm:$0xff]  ;;  %s107_s21 = scalar_lea.vmem %s3276_s0, %s2783_s2  ;;  %v2790_v30 = vmov 1.0|1.0   ;;  %s106_s2 = sadd.s32 1, %s2783_s2   ;;  %s2783_s2 = sphi %s2929_s2, %s106_s2  }
  0x3b   : > { %v313_v21 = vpack.c.bf16 %v298_v19, %v297_v18  ;;  %v300_v22 = vld [vmem:[#allocation2 + $0x18] sm:$0xff]  ;;  %v301_v24 = vld [vmem:[#allocation2 + $0x20] sm:$0xff]  ;;  %v302_v25 = vld [vmem:[#allocation2 + $0x28] sm:$0xff]  ;;  %p103_p2 = scmp.ge.s32.totalorder %s106_s2, 8  }
  0x3c   : > { %v314_v23 = vpack.c.bf16 %v300_v22, %v299_v20  ;;  %v2938_v26 = vld [vmem:[%s107_s21] ss:$0 sm:$0xff]  ;;  %v315_v27 = vpack.c.bf16 %v302_v25, %v301_v24  ;;  %v303_v28 = vld [vmem:[#allocation2 + $0x30] sm:$0xff]  ;;  %v304_v29 = vld [vmem:[#allocation2 + $0x38] sm:$0xff]  ;;  %s2792_s25 = smov (%p103_p2), [#allocation10]  }
  0x3d   : > { %2139 = vmatprep.subr.bf16.mxu1 %v313_v21  ;;  %vm115_vm3 = vcmp.eq.s32.totalorder %v2888_v4, %v2938_v26  ;;  %vm116_vm4 = vcmp.eq.s32.totalorder %v2891_v5, %v2938_v26  ;;  %vm117_vm7 = vcmp.eq.s32.totalorder %v2894_v6, %v2938_v26  ;;  %vm118_vm8 = vcmp.eq.s32.totalorder %v2897_v7, %v2938_v26  ;;  %v2379_v32 = vld [vmem:[#allocation8] sm:$0xff]   ;;  %v306_v36 = vld [vmem:[#allocation2 + $0x48] sm:$0xff]  ;;  %v307_v38 = vld [vmem:[#allocation2 + $0x50] sm:$0xff]  ;;  %s1897_s26 = sshll.u32 (%p103_p2), %s2792_s25, 4  ;;  %s1898_s26 = int_to_ptr.vmem [resolvable:$true] %s1897_s26 }
  0x3e   : > { %2140 = vmatpush3.bf16.msra.mxu1 %v313_v21  ;;  %vm2949_vm6 = vmpackc.low %vm116_vm4, %vm115_vm3  ;;  %v305_v33 = vld [vmem:[#allocation2 + $0x40] sm:$0xff]  ;;  %v316_v35 = vpack.c.bf16 %v304_v29, %v303_v28  ;;  %2155 = vmatprep.mubr.bf16.mxu1 %v2379_v32  ;;  %vm119_vm10 = vcmp.eq.s32.totalorder %v2900_v8, %v2938_v26  ;;  %vm120_vm11 = vcmp.eq.s32.totalorder %v2903_v9, %v2938_v26  ;;  %v308_v41 = vld [vmem:[#allocation2 + $0x58] sm:$0xff]  ;;  %s2749_s27 = scalar_lea.vmem (%p103_p2), %s1898_s26, 16  ;;  %s2753_s28 = scalar_lea.vmem (%p103_p2), %s1898_s26, 32 }
  0x3f   : > { %2141 = vmatprep.subr.bf16.mxu1 %v314_v23  ;;  %vm2961_vm9 = vmpackc.low %vm118_vm8, %vm117_vm7  ;;  %v2381_v37 = vld [vmem:[#allocation5] sm:$0xff]   ;;  %v317_v40 = vpack.c.bf16 %v306_v36, %v305_v33  ;;  %vm121_vm13 = vcmp.eq.s32.totalorder %v2906_v10, %v2938_v26  ;;  %vm122_vm14 = vcmp.eq.s32.totalorder %v2909_v11, %v2938_v26  ;;  %v318_v43 = vpack.c.bf16 %v308_v41, %v307_v38  ;;  %v310_v44 = vld [vmem:[#allocation2 + $0x68] sm:$0xff]  ;;  %p2750_p3 = scmp.ne.s32.totalorder (%p103_p2), %s1898_s26, %s2749_s27  ;;  %p2754_p4 = scmp.lt.s32.totalorder (%p103_p2), %s1898_s26, %s1898_s26 }
  0x40   : > { %v3285_v2 = vld [vmem:[#allocation14_spill] sm:$0xff]  ;;  %v3286_v3 = vld [vmem:[#allocation15_spill] sm:$0xff]  ;;  %vm2975_vm12 = vmpackc.low %vm120_vm11, %vm119_vm10  ;;  %2235 = vmatprep.mubr.bf16.mxu0 %v2381_v37  ;;  %vm125_vm4 = vcmp.eq.s32.totalorder %v2918_v14, %v2938_v26  ;;  %vm127_vm7 = vcmp.eq.s32.totalorder %v2924_v16, %v2938_v26  ;;  %vm128_vm8 = vcmp.eq.s32.totalorder %v2927_v17, %v2938_v26  ;;  %vm1889_vm10 = vcmask (%p103_p2), 57344   ;;  %p2755_p5 = scmp.lt.s32.totalorder (%p103_p2), %s2753_s28, %s2749_s27 }
  0x41   : > { %vm113_vm1 = vcmp.eq.s32.totalorder %v3285_v2, %v2938_v26  ;;  %vm114_vm2 = vcmp.eq.s32.totalorder %v3286_v3, %v2938_v26  ;;  %v309_v42 = vld [vmem:[#allocation2 + $0x60] sm:$0xff]  ;;  %vm2002_vm15 = vmpackc.low %vm122_vm14, %vm121_vm13  ;;  %v311_v45 = vld [vmem:[#allocation2 + $0x70] sm:$0xff] }
  0x42   : > { %vm1994_vm5 = vmpackc.low %vm114_vm2, %vm113_vm1  ;;  %2142 = vmatpush3.bf16.msra.mxu1 %v314_v23  ;;  %vm123_vm1 = vcmp.eq.s32.totalorder %v2912_v12, %v2938_v26  ;;  %vm124_vm2 = vcmp.eq.s32.totalorder %v2915_v13, %v2938_v26  ;;  %v319_v46 = vpack.c.bf16 %v310_v44, %v309_v42  ;;  %v312_v47 = vld [vmem:[#allocation2 + $0x78] sm:$0xff]  ;;  %v2380_v49 = vld [vmem:[#allocation8 + $0x8] sm:$0xff]   ;;  %p2756_p6 = por (%p103_p2), %p2755_p5, %p2754_p4 }
  0x43   : > { %2219 = vmatprep.subr.msk.bf16.mxu0 %vm1994_vm5, %v2790_v30  ;;  %2143 = vmatprep.subr.bf16.mxu1 %v315_v27  ;;  %vm2004_vm3 = vmpackc.low %vm124_vm2, %vm123_vm1  ;;  %v320_v48 = vpack.c.bf16 %v312_v47, %v311_v45  ;;  %v2383_v50 = vld [vmem:[#allocation8 + $0x10] sm:$0xff]   ;;  %v2382_v51 = vld [vmem:[#allocation5 + $0x8] sm:$0xff]  }
  0x44   : > { %2220 = vmatpush3.bf16.msk.msra.mxu0 %vm1994_vm5, %v2790_v30  ;;  %vm126_vm5 = vcmp.eq.s32.totalorder %v2921_v15, %v2938_v26  ;;  %v2385_v52 = vld [vmem:[#allocation5 + $0x10] sm:$0xff]   ;;  %v2384_v53 = vld [vmem:[#allocation8 + $0x18] sm:$0xff]   ;;  %v2387_v54 = vld [vmem:[#allocation8 + $0x20] sm:$0xff]   ;;  %p2757_p7 = pnand (%p103_p2), %p2756_p6, %p2750_p3 }
  0x45   : > { %2221 = vmatprep.subr.msk.bf16.mxu0 %vm2949_vm6, %v2790_v30  ;;  %v2386_v55 = vld [vmem:[#allocation5 + $0x18] sm:$0xff]   ;;  %v2389_v56 = vld [vmem:[#allocation5 + $0x20] sm:$0xff]   ;;  %v2388_v57 = vld [vmem:[#allocation8 + $0x28] sm:$0xff]  }
  0x46   : > { %2144 = vmatpush3.bf16.msra.mxu1 %v315_v27  ;;  %v2391_v58 = vld [vmem:[#allocation8 + $0x30] sm:$0xff]   ;;  %v2390_v59 = vld [vmem:[#allocation5 + $0x28] sm:$0xff]   ;;  %v2392_v61 = vld [vmem:[#allocation8 + $0x38] sm:$0xff]  }
  0x47   : > { %2145 = vmatprep.subr.bf16.mxu1 %v316_v35  ;;  %v2393_v60 = vld [vmem:[#allocation5 + $0x30] sm:$0xff]   ;;  %v2395_v62 = vld [vmem:[#allocation8 + $0x40] sm:$0xff]   ;;  %v2394_v63 = vld [vmem:[#allocation5 + $0x38] sm:$0xff]  }
  0x48   : > { %2222 = vmatpush3.bf16.msk.msra.mxu0 %vm2949_vm6, %v2790_v30  ;;  %vm2006_vm6 = vmpackc.low %vm126_vm5, %vm125_vm4  ;;  %v2397_v0 = vld [vmem:[#allocation5 + $0x40] sm:$0xff]   ;;  %v2396_v1 = vld [vmem:[#allocation8 + $0x48] sm:$0xff]  }
  0x49   : > { %2223 = vmatprep.subr.msk.bf16.mxu0 %vm2961_vm9, %v2790_v30  ;;  %v2399_v18 = vld [vmem:[#allocation8 + $0x50] sm:$0xff]   ;;  %v2398_v19 = vld [vmem:[#allocation5 + $0x48] sm:$0xff]   ;;  %v2400_v21 = vld [vmem:[#allocation8 + $0x58] sm:$0xff]  }
  0x4a   : > { %2146 = vmatpush3.bf16.msra.mxu1 %v316_v35  ;;  %v2401_v20 = vld [vmem:[#allocation5 + $0x50] sm:$0xff]   ;;  %v2403_v22 = vld [vmem:[#allocation8 + $0x60] sm:$0xff]   ;;  %v2402_v23 = vld [vmem:[#allocation5 + $0x58] sm:$0xff]  }
  0x4b   : > { %2147 = vmatprep.subr.bf16.mxu1 %v317_v40  ;;  %v2405_v24 = vld [vmem:[#allocation5 + $0x60] sm:$0xff]   ;;  %v2404_v25 = vld [vmem:[#allocation8 + $0x68] sm:$0xff]   ;;  %v2407_v26 = vld [vmem:[#allocation8 + $0x70] sm:$0xff]  }
  0x4c   : > { %2224 = vmatpush3.bf16.msk.msra.mxu0 %vm2961_vm9, %v2790_v30  ;;  %vm2008_vm9 = vmpackc.low %vm128_vm8, %vm127_vm7  ;;  %v2406_v27 = vld [vmem:[#allocation5 + $0x68] sm:$0xff]   ;;  %v2409_v28 = vld [vmem:[#allocation5 + $0x70] sm:$0xff]  }
  0x4d   : > { %2225 = vmatprep.subr.msk.bf16.mxu0 %vm2975_vm12, %v2790_v30  ;;  %v2408_v29 = vld [vmem:[#allocation8 + $0x78] sm:$0xff]   ;;  %v2413_v32 = vld [vmem:[#allocation5 + $0x80] sm:$0xff]   ;;  %v2412_v33 = vld [vmem:[#allocation8 + $0x88] sm:$0xff]  }
  0x4e   : > { %2148 = vmatpush3.bf16.msra.mxu1 %v317_v40  ;;  %v2410_v31 = vld [vmem:[#allocation5 + $0x78] sm:$0xff]   ;;  %v2415_v34 = vld [vmem:[#allocation8 + $0x90] sm:$0xff]   ;;  %v2414_v35 = vld [vmem:[#allocation5 + $0x88] sm:$0xff]  }
  0x4f   : > { %2149 = vmatprep.subr.bf16.mxu1 %v318_v43  ;;  %v2417_v36 = vld [vmem:[#allocation5 + $0x90] sm:$0xff]   ;;  %v2416_v37 = vld [vmem:[#allocation8 + $0x98] sm:$0xff]   ;;  %v2419_v38 = vld [vmem:[#allocation8 + $0xa0] sm:$0xff]  }
  0x50   : > { %2226 = vmatpush3.bf16.msk.msra.mxu0 %vm2975_vm12, %v2790_v30  ;;  %v2418_v39 = vld [vmem:[#allocation5 + $0x98] sm:$0xff]   ;;  %v2421_v40 = vld [vmem:[#allocation5 + $0xa0] sm:$0xff]   ;;  %v2420_v41 = vld [vmem:[#allocation8 + $0xa8] sm:$0xff]  }
  0x51   : > { %2227 = vmatprep.subr.msk.bf16.mxu0 %vm2002_vm15, %v2790_v30  ;;  %v2423_v42 = vld [vmem:[#allocation8 + $0xb0] sm:$0xff]   ;;  %v2424_v45 = vld [vmem:[#allocation8 + $0xb8] sm:$0xff]   ;;  %v1732_v4 = vld [vmem:[%s3279_s3 + $0x8] sm:$0xff] (%p103_p2) }
  0x52   : > { %2150 = vmatpush3.bf16.msra.mxu1 %v318_v43  ;;  %v2422_v43 = vld [vmem:[#allocation5 + $0xa8] sm:$0xff]   ;;  %v2425_v44 = vld [vmem:[#allocation5 + $0xb0] sm:$0xff]   ;;  %v2426_v47 = vld [vmem:[#allocation5 + $0xb8] sm:$0xff]  }
  0x53   : > { %2151 = vmatprep.subr.bf16.mxu1 %v319_v46  ;;  %v1736_v5 = vld [vmem:[%s3279_s3 + $0x28] sm:$0xff] (%p103_p2)  ;;  %v1735_v6 = vld [vmem:[%s3279_s3 + $0x20] sm:$0xff] (%p103_p2)  ;;  %v1738_v7 = vld [vmem:[%s3279_s3 + $0x38] sm:$0xff] (%p103_p2) }
  0x54   : > { %2228 = vmatpush3.bf16.msk.msra.mxu0 %vm2002_vm15, %v2790_v30  ;;  %v1737_v8 = vld [vmem:[%s3279_s3 + $0x30] sm:$0xff] (%p103_p2)  ;;  %v1740_v9 = vld [vmem:[%s3279_s3 + $0x48] sm:$0xff] (%p103_p2)  ;;  %v1739_v10 = vld [vmem:[%s3279_s3 + $0x40] sm:$0xff] (%p103_p2) }
  0x55   : > { %2229 = vmatprep.subr.msk.bf16.mxu0 %vm2004_vm3, %v2790_v30  ;;  %v1742_v11 = vld [vmem:[%s3279_s3 + $0x58] sm:$0xff] (%p103_p2)  ;;  %v1741_v12 = vld [vmem:[%s3279_s3 + $0x50] sm:$0xff] (%p103_p2)  ;;  %v1744_v13 = vld [vmem:[%s3279_s3 + $0x68] sm:$0xff] (%p103_p2) }
  0x56   : > { %2152 = vmatpush3.bf16.msra.mxu1 %v319_v46  ;;  %v2427_v46 = vld [vmem:[#allocation8 + $0xc0] sm:$0xff]   ;;  %v1746_v15 = vld [vmem:[%s3279_s3 + $0x78] sm:$0xff] (%p103_p2)  ;;  %v1745_v16 = vld [vmem:[%s3279_s3 + $0x70] sm:$0xff] (%p103_p2) }
  0x57   : > { %2153 = vmatprep.subr.bf16.mxu1 %v320_v48  ;;  %v1743_v14 = vld [vmem:[%s3279_s3 + $0x60] sm:$0xff] (%p103_p2) }
  0x58   : > { %2230 = vmatpush3.bf16.msk.msra.mxu0 %vm2004_vm3, %v2790_v30 }
  0x59   : > { %2231 = vmatprep.subr.msk.bf16.mxu0 %vm2006_vm6, %v2790_v30 }
  0x5a   : > { %2154 = vmatpush3.bf16.msra.mxu1 %v320_v48  ;;  %v2429_v48 = vld [vmem:[#allocation5 + $0xc0] sm:$0xff]  }
  0x5c   : > { %2232 = vmatpush3.bf16.msk.msra.mxu0 %vm2006_vm6, %v2790_v30 }
  0x5d   : > { %2233 = vmatprep.subr.msk.bf16.mxu0 %vm2008_vm9, %v2790_v30  ;;  %2156 = vmatmul.mubr.bf16.vlgmr.msra.gmra.mrb[0].mxu1 %v2380_v49  ;;  %v2428_v49 = vld [vmem:[#allocation8 + $0xc8] sm:$0xff]  }
  0x5e   : > { %2159 = vmatprep.mubr.bf16.mxu1 %v2383_v50  ;;  %v2431_v50 = vld [vmem:[#allocation8 + $0xd0] sm:$0xff]  }
  0x60   : > { %2234 = vmatpush3.bf16.msk.msra.mxu0 %vm2008_vm9, %v2790_v30  ;;  %v2411_v30 = vld [vmem:[#allocation8 + $0x80] sm:$0xff]  }
  0x63   : > { %2236 = vmatmul.mubr.bf16.vlgmr.msra.gmra.mrb[0].mxu0 %v2382_v51  ;;  %v2430_v51 = vld [vmem:[#allocation5 + $0xc8] sm:$0xff]  }
  0x64   : > { %2239 = vmatprep.mubr.bf16.mxu0 %v2385_v52  ;;  %v2433_v52 = vld [vmem:[#allocation5 + $0xd0] sm:$0xff]  }
  0x65   : > { %2160 = vmatmul.mubr.bf16.gmra.mrb[4].mxu1 %v2384_v53  ;;  %v2432_v53 = vld [vmem:[#allocation8 + $0xd8] sm:$0xff]  }
  0x66   : > { %2163 = vmatprep.mubr.bf16.mxu1 %v2387_v54  ;;  %v2435_v54 = vld [vmem:[#allocation8 + $0xe0] sm:$0xff]  }
  0x6b   : > { %2240 = vmatmul.mubr.bf16.gmra.mrb[4].mxu0 %v2386_v55  ;;  %v2434_v55 = vld [vmem:[#allocation5 + $0xd8] sm:$0xff]  }
  0x6c   : > { %2243 = vmatprep.mubr.bf16.mxu0 %v2389_v56  ;;  %v2437_v56 = vld [vmem:[#allocation5 + $0xe0] sm:$0xff]  }
  0x6d   : > { %2164 = vmatmul.mubr.bf16.gmra.mrb[8].mxu1 %v2388_v57  ;;  %v2436_v57 = vld [vmem:[#allocation8 + $0xe8] sm:$0xff]  }
  0x6e   : > { %2167 = vmatprep.mubr.bf16.mxu1 %v2391_v58  ;;  %v2439_v58 = vld [vmem:[#allocation8 + $0xf0] sm:$0xff]  }
  0x73   : > { %2244 = vmatmul.mubr.bf16.gmra.mrb[8].mxu0 %v2390_v59  ;;  %v2438_v59 = vld [vmem:[#allocation5 + $0xe8] sm:$0xff]  }
  0x74   : > { %2247 = vmatprep.mubr.bf16.mxu0 %v2393_v60  ;;  %v2441_v60 = vld [vmem:[#allocation5 + $0xf0] sm:$0xff]  }
  0x75   : > { %2168 = vmatmul.mubr.bf16.gmra.mrb[12].mxu1 %v2392_v61  ;;  %v2440_v61 = vld [vmem:[#allocation8 + $0xf8] sm:$0xff]  }
  0x76   : > { %2171 = vmatprep.mubr.bf16.mxu1 %v2395_v62  ;;  %v2442_v62 = vld [vmem:[#allocation5 + $0xf8] sm:$0xff]  }
  0x7b   : > { %2248 = vmatmul.mubr.bf16.gmra.mrb[12].mxu0 %v2394_v63 }
  0x7c   : > { %2251 = vmatprep.mubr.bf16.mxu0 %v2397_v0 }
  0x7d   : > { %2172 = vmatmul.mubr.bf16.gmra.mrb[16].mxu1 %v2396_v1 }
  0x7e   : > { %2175 = vmatprep.mubr.bf16.mxu1 %v2399_v18 }
  0x83   : > { %2252 = vmatmul.mubr.bf16.gmra.mrb[16].mxu0 %v2398_v19 }
  0x84   : > { %2255 = vmatprep.mubr.bf16.mxu0 %v2401_v20 }
  0x85   : > { %2176 = vmatmul.mubr.bf16.gmra.mrb[20].mxu1 %v2400_v21 }
  0x86   : > { %2179 = vmatprep.mubr.bf16.mxu1 %v2403_v22 }
  0x8b   : > { %2256 = vmatmul.mubr.bf16.gmra.mrb[20].mxu0 %v2402_v23 }
  0x8c   : > { %2259 = vmatprep.mubr.bf16.mxu0 %v2405_v24 }
  0x8d   : > { %2180 = vmatmul.mubr.bf16.gmra.mrb[24].mxu1 %v2404_v25 }
  0x8e   : > { %2183 = vmatprep.mubr.bf16.mxu1 %v2407_v26 }
  0x93   : > { %2260 = vmatmul.mubr.bf16.gmra.mrb[24].mxu0 %v2406_v27 }
  0x94   : > { %2263 = vmatprep.mubr.bf16.mxu0 %v2409_v28 }
  0x95   : > { %2184 = vmatmul.mubr.bf16.gmra.mrb[28].mxu1 %v2408_v29 }
  0x96   : > { %2187 = vmatprep.mubr.bf16.mxu1 %v2411_v30 }
  0x9b   : > { %2264 = vmatmul.mubr.bf16.gmra.mrb[28].mxu0 %v2410_v31 }
  0x9c   : > { %2267 = vmatprep.mubr.bf16.mxu0 %v2413_v32 }
  0x9d   : > { %2188 = vmatmul.mubr.bf16.gmra.mrb[32].mxu1 %v2412_v33 }
  0x9e   : > { %2191 = vmatprep.mubr.bf16.mxu1 %v2415_v34 }
  0xa3   : > { %2268 = vmatmul.mubr.bf16.gmra.mrb[32].mxu0 %v2414_v35 }
  0xa4   : > { %2271 = vmatprep.mubr.bf16.mxu0 %v2417_v36 }
  0xa5   : > { %2192 = vmatmul.mubr.bf16.gmra.mrb[36].mxu1 %v2416_v37 }
  0xa6   : > { %2195 = vmatprep.mubr.bf16.mxu1 %v2419_v38 }
  0xab   : > { %2272 = vmatmul.mubr.bf16.gmra.mrb[36].mxu0 %v2418_v39 }
  0xac   : > { %2275 = vmatprep.mubr.bf16.mxu0 %v2421_v40 }
  0xad   : > { %2196 = vmatmul.mubr.bf16.gmra.mrb[40].mxu1 %v2420_v41 }
  0xae   : > { %2199 = vmatprep.mubr.bf16.mxu1 %v2423_v42 }
  0xb3   : > { %2276 = vmatmul.mubr.bf16.gmra.mrb[40].mxu0 %v2422_v43 }
  0xb4   : > { %2279 = vmatprep.mubr.bf16.mxu0 %v2425_v44 }
  0xb5   : > { %2200 = vmatmul.mubr.bf16.gmra.mrb[44].mxu1 %v2424_v45 }
  0xb6   : > { %2203 = vmatprep.mubr.bf16.mxu1 %v2427_v46 }
  0xbb   : > { %2280 = vmatmul.mubr.bf16.gmra.mrb[44].mxu0 %v2426_v47 }
  0xbc   : > { %2283 = vmatprep.mubr.bf16.mxu0 %v2429_v48 }
  0xbd   : > { %2204 = vmatmul.mubr.bf16.gmra.mrb[48].mxu1 %v2428_v49 }
  0xbe   : > { %2207 = vmatprep.mubr.bf16.mxu1 %v2431_v50 }
  0xc3   : > { %2284 = vmatmul.mubr.bf16.gmra.mrb[48].mxu0 %v2430_v51 }
  0xc4   : > { %2287 = vmatprep.mubr.bf16.mxu0 %v2433_v52 }
  0xc5   : > { %2208 = vmatmul.mubr.bf16.gmra.mrb[52].mxu1 %v2432_v53 }
  0xc6   : > { %2211 = vmatprep.mubr.bf16.mxu1 %v2435_v54 }
  0xcb   : > { %2288 = vmatmul.mubr.bf16.gmra.mrb[52].mxu0 %v2434_v55 }
  0xcc   : > { %2291 = vmatprep.mubr.bf16.mxu0 %v2437_v56 }
  0xcd   : > { %2212 = vmatmul.mubr.bf16.gmra.mrb[56].mxu1 %v2436_v57 }
  0xce   : > { %2215 = vmatprep.mubr.bf16.mxu1 %v2439_v58 }
  0xd3   : > { %2292 = vmatmul.mubr.bf16.gmra.mrb[56].mxu0 %v2438_v59 }
  0xd4   : > { %2295 = vmatprep.mubr.bf16.mxu0 %v2441_v60 }
  0xd5   : > { %2216 = vmatmul.mubr.bf16.gmra.mrb[60].mxu1 %v2440_v61 }
  0xdb   : > { %2296 = vmatmul.mubr.bf16.gmra.mrb[60].mxu0 %v2442_v62 }
 0x130   : > { %v2157_v63 = vpop.f32.mrb[0].mxu1 }
 0x131   : > { %v547_v0 = vpop.f32.mrb[1].mxu1 }
 0x132   : > { %v2158_v1 = vpop.f32.mrb[2].mxu1 }
 0x133   : > { %v550_v18 = vpop.f32.mrb[3].mxu1 }
 0x136   : > { %v2237_v19 = vpop.f32.mrb[0].mxu0 }
 0x137   : > { %v1037_v20 = vadd.f32 %v2237_v19, %v2157_v63  ;;  %v1028_v21 = vpop.f32.mrb[1].mxu0 }
 0x138   : > { %v1029_v22 = vadd.f32 %v1028_v21, %v547_v0  ;;  %v2238_v23 = vpop.f32.mrb[2].mxu0  ;;  %v2161_v29 = vpop.f32.mrb[4].mxu1 }
 0x139   : > { %v1040_v24 = vadd.f32 %v2238_v23, %v2158_v1  ;;  %v1031_v25 = vpop.f32.mrb[3].mxu0  ;;  %v2012_v26 = vmul.f32 -1.442695, %v1037_v20  ;;  %v563_v31 = vpop.f32.mrb[5].mxu1 }
 0x13a   : > { %v1032_v27 = vadd.f32 %v1031_v25, %v550_v18  ;;  %v2010_v28 = vmul.f32 -1.442695, %v1029_v22  ;;  %v2162_v32 = vpop.f32.mrb[6].mxu1 }
 0x13b   : > { %v2013_v30 = vmul.f32 -1.442695, %v1040_v24  ;;  %2443 = vpow2.f32 %v2012_v26  ;;  %v566_v33 = vpop.f32.mrb[7].mxu1 }
 0x13c   : > { %2445 = vpow2.f32 %v2010_v28  ;;  %v2011_v37 = vmul.f32 -1.442695, %v1032_v27 }
 0x13d   : > { %2447 = vpow2.f32 %v2013_v30 }
 0x13e   : > { %v2241_v34 = vpop.f32.mrb[4].mxu0  ;;  %2449 = vpow2.f32 %v2011_v37 }
 0x13f   : > { %v1053_v35 = vadd.f32 %v2241_v34, %v2161_v29  ;;  %v1044_v36 = vpop.f32.mrb[5].mxu0 }
 0x140   : > { %v1045_v38 = vadd.f32 %v1044_v36, %v563_v31  ;;  %v2242_v39 = vpop.f32.mrb[6].mxu0  ;;  %v2165_v45 = vpop.f32.mrb[8].mxu1 }
 0x141   : > { %v1056_v40 = vadd.f32 %v2242_v39, %v2162_v32  ;;  %v1047_v41 = vpop.f32.mrb[7].mxu0  ;;  %v2016_v42 = vmul.f32 -1.442695, %v1053_v35  ;;  %v579_v46 = vpop.f32.mrb[9].mxu1 }
 0x142   : > { %v1048_v43 = vadd.f32 %v1047_v41, %v566_v33  ;;  %v2014_v44 = vmul.f32 -1.442695, %v1045_v38  ;;  %v2166_v47 = vpop.f32.mrb[10].mxu1 }
 0x143   : > { %2451 = vpow2.f32 %v2016_v42  ;;  %v582_v48 = vpop.f32.mrb[11].mxu1  ;;  %v2017_v53 = vmul.f32 -1.442695, %v1056_v40 }
 0x144   : > { %2453 = vpow2.f32 %v2014_v44  ;;  %v2015_v60 = vmul.f32 -1.442695, %v1048_v43 }
 0x145   : > { %v2444_v52 = vpop.eup %2443  ;;  %2455 = vpow2.f32 %v2017_v53 }
 0x146   : > { %v2245_v49 = vpop.f32.mrb[8].mxu0  ;;  %v2446_v56 = vpop.eup %2445  ;;  %v1333_v62 = vadd.f32 1.0, %v2444_v52  ;;  %2457 = vpow2.f32 %v2015_v60 }
 0x147   : > { %v1069_v50 = vadd.f32 %v2245_v49, %v2165_v45  ;;  %v1060_v51 = vpop.f32.mrb[9].mxu0  ;;  %v2448_v59 = vpop.eup %2447  ;;  %v1331_v0 = vadd.f32 1.0, %v2446_v56 }
 0x148   : > { %v1061_v54 = vadd.f32 %v1060_v51, %v579_v46  ;;  %v2246_v55 = vpop.f32.mrb[10].mxu0  ;;  %v2169_v63 = vpop.f32.mrb[12].mxu1  ;;  %v1334_v18 = vadd.f32 1.0, %v2448_v59  ;;  %2459 = vrcp.f32 %v1333_v62 }
 0x149   : > { %v1072_v57 = vadd.f32 %v2246_v55, %v2166_v47  ;;  %v1063_v58 = vpop.f32.mrb[11].mxu0  ;;  %v595_v1 = vpop.f32.mrb[13].mxu1  ;;  %v2020_v21 = vmul.f32 -1.442695, %v1069_v50  ;;  %2461 = vrcp.f32 %v1331_v0 }
 0x14a   : > { %v1064_v61 = vadd.f32 %v1063_v58, %v582_v48  ;;  %v2170_v19 = vpop.f32.mrb[14].mxu1  ;;  %v2450_v20 = vpop.eup %2449  ;;  %v2018_v24 = vmul.f32 -1.442695, %v1061_v54  ;;  %2463 = vrcp.f32 %v1334_v18 }
 0x14b   : > { %v598_v22 = vpop.f32.mrb[15].mxu1  ;;  %v2021_v28 = vmul.f32 -1.442695, %v1072_v57  ;;  %v1332_v32 = vadd.f32 1.0, %v2450_v20  ;;  %2465 = vpow2.f32 %v2020_v21 }
 0x14c   : > { %v2019_v35 = vmul.f32 -1.442695, %v1064_v61  ;;  %2467 = vpow2.f32 %v2018_v24 }
 0x14d   : > { %v2452_v27 = vpop.eup %2451  ;;  %2469 = vpow2.f32 %v2021_v28 }
 0x14e   : > { %v2249_v23 = vpop.f32.mrb[12].mxu0  ;;  %v2454_v31 = vpop.eup %2453  ;;  %v1337_v37 = vadd.f32 1.0, %v2452_v27  ;;  %2471 = vrcp.f32 %v1332_v32 }
 0x14f   : > { %v1085_v25 = vadd.f32 %v2249_v23, %v2169_v63  ;;  %v1076_v26 = vpop.f32.mrb[13].mxu0  ;;  %v1335_v39 = vadd.f32 1.0, %v2454_v31  ;;  %v2456_v43 = vpop.eup %2455  ;;  %2473 = vpow2.f32 %v2019_v35 }
 0x150   : > { %v1077_v29 = vadd.f32 %v1076_v26, %v595_v1  ;;  %v2250_v30 = vpop.f32.mrb[14].mxu0  ;;  %v2173_v38 = vpop.f32.mrb[16].mxu1  ;;  %2475 = vrcp.f32 %v1337_v37  ;;  %v1338_v55 = vadd.f32 1.0, %v2456_v43 }
 0x151   : > { %v1088_v33 = vadd.f32 %v2250_v30, %v2170_v19  ;;  %v1079_v34 = vpop.f32.mrb[15].mxu0  ;;  %v611_v40 = vpop.f32.mrb[17].mxu1  ;;  %v2024_v41 = vmul.f32 -1.442695, %v1085_v25  ;;  %2477 = vrcp.f32 %v1335_v39 }
 0x152   : > { %v1080_v36 = vadd.f32 %v1079_v34, %v598_v22  ;;  %v2174_v42 = vpop.f32.mrb[18].mxu1  ;;  %v2022_v44 = vmul.f32 -1.442695, %v1077_v29  ;;  %v2458_v50 = vpop.eup %2457 }
 0x153   : > { %v614_v45 = vpop.f32.mrb[19].mxu1  ;;  %v2025_v47 = vmul.f32 -1.442695, %v1088_v33  ;;  %v3012_v54 = vpop.eup %2459  ;;  %2479 = vpow2.f32 %v2024_v41  ;;  %v1336_v23 = vadd.f32 1.0, %v2458_v50 }
 0x154   : > { %v2023_v51 = vmul.f32 -1.442695, %v1080_v36  ;;  %v3014_v58 = vpop.eup %2461  ;;  %2481 = vpow2.f32 %v2022_v44 }
 0x155   : > { %v3016_v61 = vpop.eup %2463  ;;  %2483 = vpow2.f32 %v2025_v47 }
 0x156   : > { %v2253_v46 = vpop.f32.mrb[16].mxu0  ;;  %v2466_v0 = vpop.eup %2465  ;;  %2485 = vpow2.f32 %v2023_v51 }
 0x157   : > { %v1101_v48 = vadd.f32 %v2253_v46, %v2173_v38  ;;  %v1092_v49 = vpop.f32.mrb[17].mxu0  ;;  %v2468_v19 = vpop.eup %2467  ;;  %2487 = vrcp.f32 %v1338_v55  ;;  %v1341_v27 = vadd.f32 1.0, %v2466_v0 }
 0x158   : > { %v1093_v52 = vadd.f32 %v1092_v49, %v611_v40  ;;  %v2254_v53 = vpop.f32.mrb[18].mxu0  ;;  %v2177_v63 = vpop.f32.mrb[20].mxu1  ;;  %v1339_v31 = vadd.f32 1.0, %v2468_v19 }
 0x159   : > { %v1104_v56 = vadd.f32 %v2254_v53, %v2174_v42  ;;  %v1095_v57 = vpop.f32.mrb[19].mxu0  ;;  %v2028_v59 = vmul.f32 -1.442695, %v1101_v48  ;;  %v627_v18 = vpop.f32.mrb[21].mxu1 }
 0x15a   : > { %v1096_v60 = vadd.f32 %v1095_v57, %v614_v45  ;;  %v2026_v62 = vmul.f32 -1.442695, %v1093_v52  ;;  %v2178_v21 = vpop.f32.mrb[22].mxu1  ;;  %v2470_v22 = vpop.eup %2469 }
 0x15b   : > { %v2029_v1 = vmul.f32 -1.442695, %v1104_v56  ;;  %2489 = vpow2.f32 %v2028_v59  ;;  %v630_v24 = vpop.f32.mrb[23].mxu1  ;;  %v3018_v26 = vpop.eup %2471  ;;  %v1342_v35 = vadd.f32 1.0, %v2470_v22 }
 0x15c   : > { %v2027_v20 = vmul.f32 -1.442695, %v1096_v60  ;;  %2491 = vpow2.f32 %v2026_v62  ;;  %v2474_v30 = vpop.eup %2473 }
 0x15d   : > { %2493 = vpow2.f32 %v2029_v1  ;;  %v3020_v34 = vpop.eup %2475  ;;  %v1340_v48 = vadd.f32 1.0, %v2474_v30 }
 0x15e   : > { %v2257_v25 = vpop.f32.mrb[20].mxu0  ;;  %2495 = vpow2.f32 %v2027_v20  ;;  %v3022_v38 = vpop.eup %2477 }
 0x15f   : > { %v1117_v28 = vadd.f32 %v2257_v25, %v2177_v63  ;;  %v1108_v29 = vpop.f32.mrb[21].mxu0  ;;  %2497 = vrcp.f32 %v1336_v23  ;;  %v2480_v41 = vpop.eup %2479 }
 0x160   : > { %v1109_v32 = vadd.f32 %v1108_v29, %v627_v18  ;;  %v2258_v33 = vpop.f32.mrb[22].mxu0  ;;  %2499 = vrcp.f32 %v1341_v27  ;;  %v2181_v43 = vpop.f32.mrb[24].mxu1  ;;  %v1345_v51 = vadd.f32 1.0, %v2480_v41 }
 0x161   : > { %v1120_v36 = vadd.f32 %v2258_v33, %v2178_v21  ;;  %v1111_v37 = vpop.f32.mrb[23].mxu0  ;;  %v2032_v39 = vmul.f32 -1.442695, %v1117_v28  ;;  %v2482_v44 = vpop.eup %2481  ;;  %2501 = vrcp.f32 %v1339_v31 }
 0x162   : > { %v1112_v40 = vadd.f32 %v1111_v37, %v630_v24  ;;  %v2030_v42 = vmul.f32 -1.442695, %v1109_v32  ;;  %v643_v46 = vpop.f32.mrb[25].mxu1  ;;  %v2484_v47 = vpop.eup %2483  ;;  %2503 = vrcp.f32 %v1342_v35  ;;  %v1343_v56 = vadd.f32 1.0, %v2482_v44 }
 0x163   : > { %v2033_v45 = vmul.f32 -1.442695, %v1120_v36  ;;  %v2182_v49 = vpop.f32.mrb[26].mxu1  ;;  %v2486_v50 = vpop.eup %2485  ;;  %2505 = vpow2.f32 %v2032_v39  ;;  %v1346_v62 = vadd.f32 1.0, %v2484_v47 }
 0x164   : > { %v646_v52 = vpop.f32.mrb[27].mxu1  ;;  %v3024_v55 = vpop.eup %2487  ;;  %2507 = vpow2.f32 %v2030_v42  ;;  %v1344_v18 = vadd.f32 1.0, %v2486_v50  ;;  %v2031_v22 = vmul.f32 -1.442695, %v1112_v40 }
 0x165   : > { %v2490_v60 = vpop.eup %2489  ;;  %2509 = vpow2.f32 %v2033_v45 }
 0x166   : > { %v2261_v53 = vpop.f32.mrb[24].mxu0  ;;  %v2492_v1 = vpop.eup %2491  ;;  %2511 = vrcp.f32 %v1340_v48  ;;  %v1429_v25 = vadd.f32 1.0, %v2490_v60 }
 0x167   : > { %v1133_v57 = vadd.f32 %v2261_v53, %v2181_v43  ;;  %v1124_v59 = vpop.f32.mrb[25].mxu0  ;;  %v2494_v21 = vpop.eup %2493  ;;  %2513 = vrcp.f32 %v1345_v51  ;;  %v1427_v29 = vadd.f32 1.0, %v2492_v1 }
 0x168   : > { %v1125_v63 = vadd.f32 %v1124_v59, %v643_v46  ;;  %v2262_v0 = vpop.f32.mrb[26].mxu0  ;;  %v2496_v24 = vpop.eup %2495  ;;  %2515 = vrcp.f32 %v1343_v56  ;;  %v1430_v32 = vadd.f32 1.0, %v2494_v21 }
 0x169   : > { %v1136_v19 = vadd.f32 %v2262_v0, %v2182_v49  ;;  %v1127_v20 = vpop.f32.mrb[27].mxu0  ;;  %v2185_v27 = vpop.f32.mrb[28].mxu1  ;;  %2517 = vrcp.f32 %v1346_v62  ;;  %v1428_v36 = vadd.f32 1.0, %v2496_v24  ;;  %v2036_v41 = vmul.f32 -1.442695, %v1133_v57 }
 0x16a   : > { %v1128_v23 = vadd.f32 %v1127_v20, %v646_v52  ;;  %v3026_v28 = vpop.eup %2497  ;;  %v659_v30 = vpop.f32.mrb[29].mxu1  ;;  %2519 = vrcp.f32 %v1344_v18  ;;  %v2034_v45 = vmul.f32 -1.442695, %v1125_v63 }
 0x16b   : > { %v3028_v31 = vpop.eup %2499  ;;  %v2186_v33 = vpop.f32.mrb[30].mxu1  ;;  %2521 = vpow2.f32 %v2031_v22  ;;  %v2037_v49 = vmul.f32 -1.442695, %v1136_v19 }
 0x16c   : > { %v3030_v35 = vpop.eup %2501  ;;  %v662_v37 = vpop.f32.mrb[31].mxu1  ;;  %2523 = vrcp.f32 %v1429_v25  ;;  %v2035_v53 = vmul.f32 -1.442695, %v1128_v23 }
 0x16d   : > { %v3032_v40 = vpop.eup %2503  ;;  %2525 = vrcp.f32 %v1427_v29 }
 0x16e   : > { %v2265_v39 = vpop.f32.mrb[28].mxu0  ;;  %v2506_v44 = vpop.eup %2505  ;;  %2527 = vrcp.f32 %v1430_v32 }
 0x16f   : > { %v1149_v42 = vadd.f32 %v2265_v39, %v2185_v27  ;;  %v1140_v43 = vpop.f32.mrb[29].mxu0  ;;  %v2508_v48 = vpop.eup %2507  ;;  %2529 = vrcp.f32 %v1428_v36  ;;  %v1433_v60 = vadd.f32 1.0, %v2506_v44 }
 0x170   : > { %v1141_v46 = vadd.f32 %v1140_v43, %v659_v30  ;;  %v2266_v47 = vpop.f32.mrb[30].mxu0  ;;  %v2510_v52 = vpop.eup %2509  ;;  %2531 = vpow2.f32 %v2036_v41  ;;  %v1431_v0 = vadd.f32 1.0, %v2508_v48 }
 0x171   : > { %v1152_v50 = vadd.f32 %v2266_v47, %v2186_v33  ;;  %v1143_v51 = vpop.f32.mrb[31].mxu0  ;;  %v3034_v59 = vpop.eup %2511  ;;  %2533 = vpow2.f32 %v2034_v45  ;;  %v1434_v18 = vadd.f32 1.0, %v2510_v52  ;;  %v2040_v24 = vmul.f32 -1.442695, %v1149_v42 }
 0x172   : > { %v1144_v56 = vadd.f32 %v1143_v51, %v662_v37  ;;  %v2189_v57 = vpop.f32.mrb[32].mxu1  ;;  %v3036_v62 = vpop.eup %2513  ;;  %2535 = vpow2.f32 %v2037_v49  ;;  %v2038_v30 = vmul.f32 -1.442695, %v1141_v46 }
 0x173   : > { %v675_v63 = vpop.f32.mrb[33].mxu1  ;;  %v3038_v1 = vpop.eup %2515  ;;  %2537 = vpow2.f32 %v2035_v53  ;;  %v2041_v37 = vmul.f32 -1.442695, %v1152_v50 }
 0x174   : > { %v2190_v19 = vpop.f32.mrb[34].mxu1  ;;  %v3040_v20 = vpop.eup %2517  ;;  %2539 = vrcp.f32 %v1433_v60  ;;  %v2039_v44 = vmul.f32 -1.442695, %v1144_v56 }
 0x175   : > { %v678_v21 = vpop.f32.mrb[35].mxu1  ;;  %v3042_v23 = vpop.eup %2519  ;;  %2541 = vrcp.f32 %v1431_v0 }
 0x176   : > { %v2269_v22 = vpop.f32.mrb[32].mxu0  ;;  %v2522_v29 = vpop.eup %2521  ;;  %2543 = vrcp.f32 %v1434_v18 }
 0x177   : > { %v1165_v25 = vadd.f32 %v2269_v22, %v2189_v57  ;;  %v1156_v27 = vpop.f32.mrb[33].mxu0  ;;  %v2524_v36 = vpop.eup %2523  ;;  %v1432_v57 = vadd.f32 1.0, %v2522_v29 }
 0x178   : > { %v1157_v32 = vadd.f32 %v1156_v27, %v675_v63  ;;  %v2270_v33 = vpop.f32.mrb[34].mxu0  ;;  %v2526_v43 = vpop.eup %2525 }
 0x179   : > { %v1168_v39 = vadd.f32 %v2270_v33, %v2190_v19  ;;  %v1159_v41 = vpop.f32.mrb[35].mxu0  ;;  %2545 = vtanh.f32 %v1165_v25  ;;  %v3044_v47 = vpop.eup %2527  ;;  %v1589_v33 = vld [vmem:[#allocation3 + $0x10] sm:$0xff] }
 0x17a   : > { %v1160_v45 = vadd.f32 %v1159_v41, %v678_v21  ;;  %2547 = vpow2.f32 %v2040_v24  ;;  %v2193_v42 = vpop.f32.mrb[36].mxu1  ;;  %v2530_v48 = vpop.eup %2529 }
 0x17b   : > { %2549 = vpow2.f32 %v2038_v30  ;;  %v691_v49 = vpop.f32.mrb[37].mxu1  ;;  %v2532_v51 = vpop.eup %2531 }
 0x17c   : > { %2551 = vpow2.f32 %v2041_v37  ;;  %v2194_v46 = vpop.f32.mrb[38].mxu1  ;;  %v2534_v52 = vpop.eup %2533  ;;  %v1437_v18 = vadd.f32 1.0, %v2532_v51  ;;  %v1587_v51 = vld [vmem:[#allocation3] sm:$0xff] }
 0x17d   : > { %2553 = vpow2.f32 %v2039_v44  ;;  %v694_v53 = vpop.f32.mrb[39].mxu1  ;;  %v2536_v60 = vpop.eup %2535  ;;  %v1435_v24 = vadd.f32 1.0, %v2534_v52 }
 0x17e   : > { %v2273_v50 = vpop.f32.mrb[36].mxu0  ;;  %2555 = vtanh.f32 %v1157_v32  ;;  %v2538_v63 = vpop.eup %2537  ;;  %v1438_v37 = vadd.f32 1.0, %v2536_v60  ;;  %v1588_v60 = vld [vmem:[#allocation3 + $0x8] sm:$0xff] }
 0x17f   : > { %v1181_v56 = vadd.f32 %v2273_v50, %v2193_v42  ;;  %v1172_v0 = vpop.f32.mrb[37].mxu0  ;;  %2557 = vtanh.f32 %v1168_v39  ;;  %v2540_v22 = vpop.eup %2539  ;;  %v1604_v3 = vmul.f32 %v2530_v48, %v1588_v60 }
 0x180   : > { %v1173_v19 = vadd.f32 %v1172_v0, %v691_v49  ;;  %v2274_v21 = vpop.f32.mrb[38].mxu0  ;;  %2559 = vtanh.f32 %v1160_v45  ;;  %v3046_v30 = vpop.eup %2541  ;;  %v1605_v49 = vmul.f32 %v2524_v36, %v1589_v33  ;;  %v1436_v45 = vadd.f32 1.0, %v2538_v63  ;;  %v1590_v0 = vld [vmem:[#allocation3 + $0x18] sm:$0xff]  ;;  %v1593_v33 = vld [vmem:[#allocation3 + $0x30] sm:$0xff] }
 0x181   : > { %v1184_v25 = vadd.f32 %v2274_v21, %v2194_v46  ;;  %v1175_v27 = vpop.f32.mrb[39].mxu0  ;;  %2561 = vtanh.f32 %v1181_v56  ;;  %v3048_v29 = vpop.eup %2543  ;;  %v1603_v36 = vmul.f32 %v2526_v43, %v1587_v51 }
 0x182   : > { %v1176_v41 = vadd.f32 %v1175_v27, %v694_v53  ;;  %2563 = vrcp.f32 %v1432_v57  ;;  %v2197_v32 = vpop.f32.mrb[40].mxu1 }
 0x183   : > { %v2546_v44 = vpop.eup %2545  ;;  %2565 = vrcp.f32 %v1437_v18  ;;  %v707_v39 = vpop.f32.mrb[41].mxu1 }
 0x184   : > { %v2548_v42 = vpop.eup %2547  ;;  %2567 = vrcp.f32 %v1435_v24  ;;  %v1621_v46 = vmul.f32 %v2546_v44, %v3012_v54  ;;  %v2198_v52 = vpop.f32.mrb[42].mxu1  ;;  %v1606_v44 = vmul.f32 %v3044_v47, %v1590_v0 }
 0x185   : > { %v2550_v50 = vpop.eup %2549  ;;  %2569 = vrcp.f32 %v1438_v37  ;;  %v710_v53 = vpop.f32.mrb[43].mxu1 }
 0x186   : > { %v2277_v56 = vpop.f32.mrb[40].mxu0  ;;  %v2552_v21 = vpop.eup %2551  ;;  %v3051_v57 = vadd.f32 %v1621_v46, %v1605_v49  ;;  %2571 = vtanh.f32 %v1173_v19  ;;  %v1441_v19 = vadd.f32 1.0, %v2548_v42 }
 0x187   : > { %v1197_v18 = vadd.f32 %v2277_v56, %v2197_v32  ;;  %v1188_v27 = vpop.f32.mrb[41].mxu0  ;;  %v2554_v2 = vpop.eup %2553  ;;  %2573 = vtanh.f32 %v1184_v25  ;;  %v1609_v25 = vmul.f32 %v2540_v22, %v1593_v33 }
 0x188   : > { %v1189_v63 = vadd.f32 %v1188_v27, %v707_v39  ;;  %v2278_v24 = vpop.f32.mrb[42].mxu0  ;;  %v2556_v54 = vpop.eup %2555  ;;  %2575 = vrcp.f32 %v1436_v45  ;;  %1701 = vst.msk [vmem:[#allocation3 + $0x10] sm:$0xff] %vm51_vm0, %v3051_v57  ;;  %v1439_v39 = vadd.f32 1.0, %v2550_v50  ;;  %v1442_v45 = vadd.f32 1.0, %v2552_v21 }
 0x189   : > { %v1200_v37 = vadd.f32 %v2278_v24, %v2198_v52  ;;  %v1191_v49 = vpop.f32.mrb[43].mxu0  ;;  %v2558_v46 = vpop.eup %2557  ;;  %v1619_v32 = vmul.f32 %v2556_v54, %v3014_v58  ;;  %2577 = vtanh.f32 %v1176_v41  ;;  %v1440_v27 = vadd.f32 1.0, %v2554_v2 }
 0x18a   : > { %v1192_v43 = vadd.f32 %v1191_v49, %v710_v53  ;;  %v2560_v51 = vpop.eup %2559  ;;  %v1622_v56 = vmul.f32 %v2558_v46, %v3016_v61  ;;  %2579 = vtanh.f32 %v1197_v18  ;;  %v2201_v47 = vpop.f32.mrb[44].mxu1  ;;  %v1591_v18 = vld [vmem:[#allocation3 + $0x20] sm:$0xff] }
 0x18b   : > { %v2562_v48 = vpop.eup %2561  ;;  %v3058_v0 = vadd.f32 %v1619_v32, %v1603_v36  ;;  %v1620_v52 = vmul.f32 %v2560_v51, %v3018_v26  ;;  %2581 = vtanh.f32 %v1189_v63  ;;  %v723_v60 = vpop.f32.mrb[45].mxu1  ;;  %v1594_v63 = vld [vmem:[#allocation3 + $0x38] sm:$0xff]  ;;  %v1597_v32 = vld [vmem:[#allocation3 + $0x50] sm:$0xff] }
 0x18c   : > { %v2564_v42 = vpop.eup %2563  ;;  %v3061_v58 = vadd.f32 %v1622_v56, %v1606_v44  ;;  %v1625_v41 = vmul.f32 %v2562_v48, %v3020_v34  ;;  %2583 = vtanh.f32 %v1200_v37  ;;  %v2202_v22 = vpop.f32.mrb[46].mxu1  ;;  %v1592_v44 = vld [vmem:[#allocation3 + $0x28] sm:$0xff]  ;;  %v1610_v56 = vmul.f32 %v3048_v29, %v1594_v63  ;;  %v1598_v48 = vld [vmem:[#allocation3 + $0x58] sm:$0xff] }
 0x18d   : > { %v2566_v50 = vpop.eup %2565  ;;  %2585 = vrcp.f32 %v1441_v19  ;;  %1699 = vst.msk [vmem:[#allocation3] sm:$0xff] %vm51_vm0, %v3058_v0  ;;  %v3066_v61 = vadd.f32 %v1620_v52, %v1604_v3  ;;  %v726_v53 = vpop.f32.mrb[47].mxu1  ;;  %v1607_v19 = vmul.f32 %v3046_v30, %v1591_v18 }
 0x18e   : > { %v2281_v21 = vpop.f32.mrb[44].mxu0  ;;  %v2568_v26 = vpop.eup %2567  ;;  %2587 = vrcp.f32 %v1439_v39  ;;  %1702 = vst.msk [vmem:[#allocation3 + $0x18] sm:$0xff] %vm51_vm0, %v3061_v58  ;;  %v3070_v2 = vadd.f32 %v1625_v41, %v1609_v25 }
 0x18f   : > { %v1213_v34 = vadd.f32 %v2281_v21, %v2201_v47  ;;  %v1204_v36 = vpop.f32.mrb[45].mxu0  ;;  %v2570_v33 = vpop.eup %2569  ;;  %2589 = vrcp.f32 %v1442_v45  ;;  %1700 = vst.msk [vmem:[#allocation3 + $0x8] sm:$0xff] %vm51_vm0, %v3066_v61  ;;  %v1595_v47 = vld [vmem:[#allocation3 + $0x40] sm:$0xff]  ;;  %v1613_v21 = vmul.f32 %v2566_v50, %v1597_v32  ;;  %v1601_v32 = vld [vmem:[#allocation3 + $0x70] sm:$0xff] }
 0x190   : > { %v1205_v3 = vadd.f32 %v1204_v36, %v723_v60  ;;  %v2282_v24 = vpop.f32.mrb[46].mxu0  ;;  %v2572_v54 = vpop.eup %2571  ;;  %2591 = vrcp.f32 %v1440_v27  ;;  %1705 = vst.msk [vmem:[#allocation3 + $0x30] sm:$0xff] %vm51_vm0, %v3070_v2  ;;  %v1608_v27 = vmul.f32 %v2564_v42, %v1592_v44  ;;  %v1611_v18 = vmul.f32 %v2568_v26, %v1595_v47  ;;  %v1602_v47 = vld [vmem:[#allocation3 + $0x78] sm:$0xff] }
 0x191   : > { %v1216_v37 = vadd.f32 %v2282_v24, %v2202_v22  ;;  %v1207_v49 = vpop.f32.mrb[47].mxu0  ;;  %v2574_v46 = vpop.eup %2573  ;;  %v1623_v51 = vmul.f32 %v2572_v54, %v3022_v38  ;;  %2593 = vtanh.f32 %v1192_v43  ;;  %v1614_v36 = vmul.f32 %v2570_v33, %v1598_v48 }
 0x192   : > { %v1208_v25 = vadd.f32 %v1207_v49, %v726_v53  ;;  %v3078_v39 = vpop.eup %2575  ;;  %v1626_v45 = vmul.f32 %v2574_v46, %v3024_v55  ;;  %2595 = vtanh.f32 %v1213_v34  ;;  %v2205_v52 = vpop.f32.mrb[48].mxu1 }
 0x193   : > { %v2578_v60 = vpop.eup %2577  ;;  %v1639_v41 = vadd.f32 %v1623_v51, %v1607_v19  ;;  %2597 = vtanh.f32 %v1205_v3  ;;  %v739_v30 = vpop.f32.mrb[49].mxu1  ;;  %v1596_v19 = vld [vmem:[#allocation3 + $0x48] sm:$0xff] }
 0x194   : > { %v2580_v22 = vpop.eup %2579  ;;  %v3082_v38 = vadd.f32 %v1626_v45, %v1610_v56  ;;  %v1624_v43 = vmul.f32 %v2578_v60, %v3026_v28  ;;  %2599 = vtanh.f32 %v1216_v37  ;;  %v2206_v53 = vpop.f32.mrb[50].mxu1  ;;  %v1599_v56 = vld [vmem:[#allocation3 + $0x60] sm:$0xff] }
 0x195   : > { %v2582_v29 = vpop.eup %2581  ;;  %2601 = vtanh.f32 %v3051_v57  ;;  %1703 = vst.msk [vmem:[#allocation3 + $0x20] sm:$0xff] %vm51_vm0, %v1639_v41  ;;  %v1629_v55 = vmul.f32 %v2580_v22, %v3028_v31  ;;  %v742_v42 = vpop.f32.mrb[51].mxu1 }
 0x196   : > { %v2285_v34 = vpop.f32.mrb[48].mxu0  ;;  %v2584_v63 = vpop.eup %2583  ;;  %2603 = vtanh.f32 %v3058_v0  ;;  %1706 = vst.msk [vmem:[#allocation3 + $0x38] sm:$0xff] %vm51_vm0, %v3082_v38  ;;  %v3091_v28 = vadd.f32 %v1624_v43, %v1608_v27  ;;  %v1627_v50 = vmul.f32 %v2582_v29, %v3030_v35 }
 0x197   : > { %v1229_v26 = vadd.f32 %v2285_v34, %v2205_v52  ;;  %v1220_v33 = vpop.f32.mrb[49].mxu0  ;;  %v2586_v3 = vpop.eup %2585  ;;  %v3094_v57 = vadd.f32 %v1629_v55, %v1613_v21  ;;  %v1630_v24 = vmul.f32 %v2584_v63, %v3032_v40  ;;  %2605 = vtanh.f32 %v1208_v25 }
 0x198   : > { %v1221_v31 = vadd.f32 %v1220_v33, %v739_v30  ;;  %v2286_v54 = vpop.f32.mrb[50].mxu0  ;;  %v2588_v44 = vpop.eup %2587  ;;  %2607 = vtanh.f32 %v3061_v58  ;;  %1704 = vst.msk [vmem:[#allocation3 + $0x28] sm:$0xff] %vm51_vm0, %v3091_v28  ;;  %v3100_v0 = vadd.f32 %v1627_v50, %v1611_v18  ;;  %v1612_v30 = vmul.f32 %v3078_v39, %v1596_v19 }
 0x199   : > { %v2044_v37 = vmul.f32 -1.442695, %v1229_v26  ;;  %v1232_v35 = vadd.f32 %v2286_v54, %v2206_v53  ;;  %v1223_v49 = vpop.f32.mrb[51].mxu0  ;;  %v2590_v46 = vpop.eup %2589  ;;  %2609 = vtanh.f32 %v3066_v61  ;;  %1709 = vst.msk [vmem:[#allocation3 + $0x50] sm:$0xff] %vm51_vm0, %v3094_v57  ;;  %v3105_v40 = vadd.f32 %v1630_v24, %v1614_v36 }
 0x19a   : > { %v2042_v51 = vmul.f32 -1.442695, %v1221_v31  ;;  %v1224_v58 = vadd.f32 %v1223_v49, %v742_v42  ;;  %v2592_v25 = vpop.eup %2591  ;;  %2611 = vtanh.f32 %v3070_v2  ;;  %1707 = vst.msk [vmem:[#allocation3 + $0x40] sm:$0xff] %vm51_vm0, %v3100_v0  ;;  %v2209_v45 = vpop.f32.mrb[52].mxu1  ;;  %v1617_v22 = vmul.f32 %v2586_v3, %v1601_v32 }
 0x19b   : > { %v2045_v48 = vmul.f32 -1.442695, %v1232_v35  ;;  %v2594_v52 = vpop.eup %2593  ;;  %2613 = vtanh.f32 %v1639_v41  ;;  %1710 = vst.msk [vmem:[#allocation3 + $0x58] sm:$0xff] %vm51_vm0, %v3105_v40  ;;  %v755_v60 = vpop.f32.mrb[53].mxu1  ;;  %v1615_v53 = vmul.f32 %v2588_v44, %v1599_v56  ;;  %v1618_v29 = vmul.f32 %v2590_v46, %v1602_v47 }
 0x19c   : > { %v2043_v61 = vmul.f32 -1.442695, %v1224_v58  ;;  %v2596_v27 = vpop.eup %2595  ;;  %v1628_v21 = vmul.f32 %v2594_v52, %v3034_v59  ;;  %2615 = vpow2.f32 %v2044_v37  ;;  %v2210_v2 = vpop.f32.mrb[54].mxu1  ;;  %v1600_v59 = vld [vmem:[#allocation3 + $0x68] sm:$0xff] }
 0x19d   : > { %v2598_v43 = vpop.eup %2597  ;;  %v1633_v18 = vmul.f32 %v2596_v27, %v3036_v62  ;;  %2617 = vpow2.f32 %v2042_v51  ;;  %v758_v41 = vpop.f32.mrb[55].mxu1 }
 0x19e   : > { %v2289_v36 = vpop.f32.mrb[52].mxu0  ;;  %v2600_v55 = vpop.eup %2599  ;;  %v3115_v42 = vadd.f32 %v1628_v21, %v1612_v30  ;;  %v1631_v34 = vmul.f32 %v2598_v43, %v3038_v1  ;;  %2619 = vpow2.f32 %v2045_v48 }
 0x19f   : > { %v1245_v39 = vadd.f32 %v2289_v36, %v2209_v45  ;;  %v1236_v63 = vpop.f32.mrb[53].mxu0  ;;  %v3118_v50 = vpop.eup %2601  ;;  %v3120_v26 = vadd.f32 %v1633_v18, %v1617_v22  ;;  %v1634_v33 = vmul.f32 %v2600_v55, %v3040_v20  ;;  %2621 = vpow2.f32 %v2043_v61 }
 0x1a0   : > { %v1237_v62 = vadd.f32 %v1236_v63, %v755_v60  ;;  %v2290_v3 = vpop.f32.mrb[54].mxu0  ;;  %v3123_v24 = vpop.eup %2603  ;;  %2623 = vtanh.f32 %v3082_v38  ;;  %1708 = vst.msk [vmem:[#allocation3 + $0x48] sm:$0xff] %vm51_vm0, %v3115_v42  ;;  %v3128_v1 = vadd.f32 %v1631_v34, %v1615_v53  ;;  %v1616_v38 = vmul.f32 %v2592_v25, %v1600_v59 }
 0x1a1   : > { %v2048_v31 = vmul.f32 -1.442695, %v1245_v39  ;;  %v1248_v54 = vadd.f32 %v2290_v3, %v2210_v2  ;;  %v1239_v44 = vpop.f32.mrb[55].mxu0  ;;  %v2606_v37 = vpop.eup %2605  ;;  %2625 = vtanh.f32 %v3091_v28  ;;  %1713 = vst.msk [vmem:[#allocation3 + $0x70] sm:$0xff] %vm51_vm0, %v3120_v26  ;;  %v3133_v20 = vadd.f32 %v1634_v33, %v1618_v29 }
 0x1a2   : > { %v2046_v35 = vmul.f32 -1.442695, %v1237_v62  ;;  %v1240_v49 = vadd.f32 %v1239_v44, %v758_v41  ;;  %v3135_v46 = vpop.eup %2607  ;;  %2627 = vtanh.f32 %v3094_v57  ;;  %1711 = vst.msk [vmem:[#allocation3 + $0x60] sm:$0xff] %vm51_vm0, %v3128_v1  ;;  %v1632_v19 = vmul.f32 %v2606_v37, %v3042_v23  ;;  %v2213_v32 = vpop.f32.mrb[56].mxu1 }
 0x1a3   : > { %v3141_v51 = vpop.eup %2609  ;;  %2629 = vtanh.f32 %v3100_v0  ;;  %1714 = vst.msk [vmem:[#allocation3 + $0x78] sm:$0xff] %vm51_vm0, %v3133_v20  ;;  %v2049_v28 = vmul.f32 -1.442695, %v1248_v54  ;;  %v771_v58 = vpop.f32.mrb[57].mxu1 }
 0x1a4   : > { %v3146_v56 = vpop.eup %2611  ;;  %v3148_v25 = vadd.f32 %v1632_v19, %v1616_v38  ;;  %2631 = vpow2.f32 %v2048_v31  ;;  %v2047_v57 = vmul.f32 -1.442695, %v1240_v49  ;;  %v2214_v47 = vpop.f32.mrb[58].mxu1 }
 0x1a5   : > { %v3150_v48 = vpop.eup %2613  ;;  %2633 = vpow2.f32 %v2046_v35  ;;  %v774_v23 = vpop.f32.mrb[59].mxu1 }
 0x1a6   : > { %v2293_v45 = vpop.f32.mrb[56].mxu0  ;;  %v2616_v52 = vpop.eup %2615  ;;  %2635 = vtanh.f32 %v3105_v40  ;;  %1712 = vst.msk [vmem:[#allocation3 + $0x68] sm:$0xff] %vm51_vm0, %v3148_v25 }
 0x1a7   : > { %v1261_v0 = vadd.f32 %v2293_v45, %v2213_v32  ;;  %v1252_v61 = vpop.f32.mrb[57].mxu0  ;;  %v2618_v60 = vpop.eup %2617  ;;  %v1541_v27 = vadd.f32 1.0, %v2616_v52  ;;  %2637 = vpow2.f32 %v2049_v28 }
 0x1a8   : > { %v1253_v30 = vadd.f32 %v1252_v61, %v771_v58  ;;  %v2294_v22 = vpop.f32.mrb[58].mxu0  ;;  %v2620_v21 = vpop.eup %2619  ;;  %v1539_v2 = vadd.f32 1.0, %v2618_v60  ;;  %2639 = vpow2.f32 %v2047_v57 }
 0x1a9   : > { %v1264_v43 = vadd.f32 %v2294_v22, %v2214_v47  ;;  %v1255_v53 = vpop.f32.mrb[59].mxu0  ;;  %v2622_v29 = vpop.eup %2621  ;;  %2641 = vrcp.f32 %v1541_v27  ;;  %v1542_v18 = vadd.f32 1.0, %v2620_v21  ;;  %v2052_v41 = vmul.f32 -1.442695, %v1261_v0 }
 0x1aa   : > { %v1256_v40 = vadd.f32 %v1255_v53, %v774_v23  ;;  %v3155_v36 = vpop.eup %2623  ;;  %2643 = vrcp.f32 %v1539_v2  ;;  %v1540_v55 = vadd.f32 1.0, %v2622_v29  ;;  %v2050_v34 = vmul.f32 -1.442695, %v1253_v30  ;;  %v2217_v39 = vpop.f32.mrb[60].mxu1 }
 0x1ab   : > { %v3157_v63 = vpop.eup %2625  ;;  %2645 = vrcp.f32 %v1542_v18  ;;  %v2053_v59 = vmul.f32 -1.442695, %v1264_v43  ;;  %v787_v33 = vpop.f32.mrb[61].mxu1 }
 0x1ac   : > { %v3159_v62 = vpop.eup %2627  ;;  %2647 = vrcp.f32 %v1540_v55  ;;  %v2051_v3 = vmul.f32 -1.442695, %v1256_v40  ;;  %v2218_v31 = vpop.f32.mrb[62].mxu1 }
 0x1ad   : > { %v3161_v54 = vpop.eup %2629  ;;  %2649 = vpow2.f32 %v2052_v41  ;;  %v790_v44 = vpop.f32.mrb[63].mxu1 }
 0x1ae   : > { %v2297_v37 = vpop.f32.mrb[60].mxu0  ;;  %v2632_v35 = vpop.eup %2631  ;;  %2651 = vpow2.f32 %v2050_v34 }
 0x1af   : > { %v1277_v49 = vadd.f32 %v2297_v37, %v2217_v39  ;;  %v1268_v38 = vpop.f32.mrb[61].mxu0  ;;  %v2634_v19 = vpop.eup %2633  ;;  %v1545_v32 = vadd.f32 1.0, %v2632_v35  ;;  %2653 = vpow2.f32 %v2053_v59 }
 0x1b0   : > { %v1269_v28 = vadd.f32 %v1268_v38, %v787_v33  ;;  %v2298_v58 = vpop.f32.mrb[62].mxu0  ;;  %v3163_v57 = vpop.eup %2635  ;;  %v1543_v47 = vadd.f32 1.0, %v2634_v19  ;;  %2655 = vpow2.f32 %v2051_v3 }
 0x1b1   : > { %v2056_v23 = vmul.f32 -1.442695, %v1277_v49  ;;  %v1280_v45 = vadd.f32 %v2298_v58, %v2218_v31  ;;  %v1271_v52 = vpop.f32.mrb[63].mxu0  ;;  %v2638_v0 = vpop.eup %2637  ;;  %2657 = vrcp.f32 %v1545_v32 }
 0x1b2   : > { %v1272_v61 = vadd.f32 %v1271_v52, %v790_v44  ;;  %v2640_v60 = vpop.eup %2639  ;;  %2659 = vrcp.f32 %v1543_v47  ;;  %v1546_v27 = vadd.f32 1.0, %v2638_v0  ;;  %v2054_v30 = vmul.f32 -1.442695, %v1269_v28 }
 0x1b3   : > { %v2642_v22 = vpop.eup %2641  ;;  %v1544_v21 = vadd.f32 1.0, %v2640_v60  ;;  %2661 = vpow2.f32 %v2056_v23  ;;  %v2057_v2 = vmul.f32 -1.442695, %v1280_v45 }
 0x1b4   : > { %v2644_v43 = vpop.eup %2643  ;;  %v1669_v53 = vmul.f32 %v2642_v22, %v3118_v50  ;;  %2663 = vrcp.f32 %v1546_v27  ;;  %v2055_v29 = vmul.f32 -1.442695, %v1272_v61 }
 0x1b5   : > { %v2646_v18 = vpop.eup %2645  ;;  %v1667_v41 = vmul.f32 %v2644_v43, %v3123_v24  ;;  %2665 = vrcp.f32 %v1544_v21 }
 0x1b6   : > { %v2648_v40 = vpop.eup %2647  ;;  %1685 = vst.msk [vmem:[#allocation2 + $0x10] sm:$0xff] %vm51_vm0, %v1669_v53  ;;  %v1670_v55 = vmul.f32 %v2646_v18, %v3135_v46  ;;  %2667 = vpow2.f32 %v2054_v30  ;;  %v1733_v18 = vld [vmem:[%s3279_s3 + $0x10] sm:$0xff] (%p103_p2) }
 0x1b7   : > { %v2650_v34 = vpop.eup %2649  ;;  %1683 = vst.msk [vmem:[#allocation2] sm:$0xff] %vm51_vm0, %v1667_v41  ;;  %v1668_v39 = vmul.f32 %v2648_v40, %v3141_v51  ;;  %2669 = vpow2.f32 %v2057_v2  ;;  %v1731_v41 = vld [vmem:[%s3279_s3] sm:$0xff] (%p103_p2)  ;;  %v2791_v40 = vmov (%p103_p2), 0  }
 0x1b8   : > { %v2652_v59 = vpop.eup %2651  ;;  %1686 = vst.msk [vmem:[#allocation2 + $0x18] sm:$0xff] %vm51_vm0, %v1670_v55  ;;  %v1549_v50 = vadd.f32 1.0, %v2650_v34  ;;  %2671 = vpow2.f32 %v2055_v29  ;;  %2700 = vset.pattern.permute.xlu1 (%p103_p2), %v2791_v40  ;;  %2699 = vset.pattern.permute.xlu0 (%p103_p2), %v2791_v40  ;;  %v1734_v55 = vld [vmem:[%s3279_s3 + $0x18] sm:$0xff] (%p103_p2)  ;;  %s1880_s3 = sld [smem:[#allocation4]] (%p103_p2) }
 0x1b9   : > { %v2654_v33 = vpop.eup %2653  ;;  %2673 = vtanh.f32 %v3115_v42  ;;  %1684 = vst.msk [vmem:[#allocation2 + $0x8] sm:$0xff] %vm51_vm0, %v1668_v39  ;;  %v1547_v24 = vadd.f32 1.0, %v2652_v59  ;;  %1759 = vperm.xlu1 (%p103_p2), %2700, %v1733_v18   ;;  %1749 = vperm.xlu0 (%p103_p2), %2699, %v1731_v41  }
 0x1ba   : > { %v2656_v3 = vpop.eup %2655  ;;  %2675 = vrcp.f32 %v1549_v50  ;;  %v1550_v46 = vadd.f32 1.0, %v2654_v33 }
 0x1bb   : > { %v2658_v31 = vpop.eup %2657  ;;  %2677 = vrcp.f32 %v1547_v24  ;;  %v1548_v44 = vadd.f32 1.0, %v2656_v3 }
 0x1bc   : > { %v2660_v37 = vpop.eup %2659  ;;  %v1673_v51 = vmul.f32 %v2658_v31, %v3146_v56  ;;  %2679 = vrcp.f32 %v1550_v46 }
 0x1bd   : > { %v2662_v35 = vpop.eup %2661  ;;  %v1671_v49 = vmul.f32 %v2660_v37, %v3150_v48  ;;  %2681 = vrcp.f32 %v1548_v44  ;;  %1764 = vperm.xlu1 (%p103_p2), %2700, %v1734_v55   ;;  %1754 = vperm.xlu0 (%p103_p2), %2699, %v1732_v4   ;;  %v1717_v59 = vld [vmem:[#allocation2 + $0x10] sm:$0xff] (%p103_p2) }
 0x1be   : > { %v2664_v38 = vpop.eup %2663  ;;  %2683 = vtanh.f32 %v3120_v26  ;;  %1689 = vst.msk [vmem:[#allocation2 + $0x30] sm:$0xff] %vm51_vm0, %v1673_v51  ;;  %v1553_v42 = vadd.f32 1.0, %v2662_v35  ;;  %v1715_v39 = vld [vmem:[#allocation2] sm:$0xff] (%p103_p2) }
 0x1bf   : > { %v2666_v19 = vpop.eup %2665  ;;  %2685 = vtanh.f32 %v3128_v1  ;;  %1687 = vst.msk [vmem:[#allocation2 + $0x20] sm:$0xff] %vm51_vm0, %v1671_v49  ;;  %v1674_v32 = vmul.f32 %v2664_v38, %v3155_v36  ;;  %v1718_v3 = vld [vmem:[#allocation2 + $0x18] sm:$0xff] (%p103_p2) }
 0x1c0   : > { %v2668_v28 = vpop.eup %2667  ;;  %v1672_v56 = vmul.f32 %v2666_v19, %v3157_v63  ;;  %2687 = vrcp.f32 %v1553_v42  ;;  %v1716_v50 = vld [vmem:[#allocation2 + $0x8] sm:$0xff] (%p103_p2) }
 0x1c1   : > { %v2670_v58 = vpop.eup %2669  ;;  %2689 = vtanh.f32 %v3133_v20  ;;  %1690 = vst.msk [vmem:[#allocation2 + $0x38] sm:$0xff] %vm51_vm0, %v1674_v32  ;;  %v1551_v26 = vadd.f32 1.0, %v2668_v28  ;;  %1774 = vperm.xlu1 (%p103_p2), %2700, %v1736_v5   ;;  %1769 = vperm.xlu0 (%p103_p2), %2699, %v1735_v6  }
 0x1c2   : > { %v2672_v48 = vpop.eup %2671  ;;  %2691 = vtanh.f32 %v3148_v25  ;;  %1688 = vst.msk [vmem:[#allocation2 + $0x28] sm:$0xff] %vm51_vm0, %v1672_v56  ;;  %v1554_v1 = vadd.f32 1.0, %v2670_v58 }
 0x1c3   : > { %v2674_v47 = vpop.eup %2673  ;;  %2693 = vrcp.f32 %v1551_v26  ;;  %v1552_v23 = vadd.f32 1.0, %v2672_v48 }
 0x1c4   : > { %v2676_v36 = vpop.eup %2675  ;;  %2695 = vrcp.f32 %v1554_v1 }
 0x1c5   : > { %v2678_v45 = vpop.eup %2677  ;;  %v1677_v63 = vmul.f32 %v2676_v36, %v3159_v62  ;;  %2697 = vrcp.f32 %v1552_v23  ;;  %1784 = vperm.xlu1 (%p103_p2), %2700, %v1738_v7   ;;  %1779 = vperm.xlu0 (%p103_p2), %2699, %v1737_v8   ;;  %v1721_v26 = vld [vmem:[#allocation2 + $0x30] sm:$0xff] (%p103_p2) }
 0x1c6   : > { %v2680_v52 = vpop.eup %2679  ;;  %v1675_v20 = vmul.f32 %v2678_v45, %v3161_v54  ;;  %v1719_v37 = vld [vmem:[#allocation2 + $0x20] sm:$0xff] (%p103_p2) }
 0x1c7   : > { %v2682_v0 = vpop.eup %2681  ;;  %1693 = vst.msk [vmem:[#allocation2 + $0x50] sm:$0xff] %vm51_vm0, %v1677_v63  ;;  %v1678_v25 = vmul.f32 %v2680_v52, %v3163_v57 }
 0x1c8   : > { %v2684_v61 = vpop.eup %2683  ;;  %1691 = vst.msk [vmem:[#allocation2 + $0x40] sm:$0xff] %vm51_vm0, %v1675_v20  ;;  %v1676_v60 = vmul.f32 %v2682_v0, %v2674_v47  ;;  %v1722_v36 = vld [vmem:[#allocation2 + $0x38] sm:$0xff] (%p103_p2) }
 0x1c9   : > { %v2686_v27 = vpop.eup %2685  ;;  %1694 = vst.msk [vmem:[#allocation2 + $0x58] sm:$0xff] %vm51_vm0, %v1678_v25  ;;  %1794 = vperm.xlu1 (%p103_p2), %2700, %v1740_v9   ;;  %1789 = vperm.xlu0 (%p103_p2), %2699, %v1739_v10   ;;  %v1720_v19 = vld [vmem:[#allocation2 + $0x28] sm:$0xff] (%p103_p2) }
 0x1ca   : > { %v2688_v30 = vpop.eup %2687  ;;  %1692 = vst.msk [vmem:[#allocation2 + $0x48] sm:$0xff] %vm51_vm0, %v1676_v60 }
 0x1cb   : > { %v2690_v62 = vpop.eup %2689  ;;  %v1681_v22 = vmul.f32 %v2688_v30, %v2684_v61 }
 0x1cc   : > { %v2692_v21 = vpop.eup %2691  ;;  %105 = sbr.rel (!%p103_p2) target bundleno = 58 (0x3a), region = 56 }
 0x1cd   : > { %v2694_v2 = vpop.eup %2693  ;;  %1697 = vst.msk [vmem:[#allocation2 + $0x70] sm:$0xff] %vm51_vm0, %v1681_v22  ;;  %1804 = vperm.xlu1 (%p103_p2), %2700, %v1742_v11   ;;  %1799 = vperm.xlu0 (%p103_p2), %2699, %v1741_v12  }
 0x1ce   : > { %v2696_v54 = vpop.eup %2695  ;;  %v1679_v43 = vmul.f32 %v2694_v2, %v2686_v27 }
 0x1cf   : > { %v2698_v53 = vpop.eup %2697  ;;  %v1682_v57 = vmul.f32 %v2696_v54, %v2690_v62  ;;  %v1723_v0 = vld [vmem:[#allocation2 + $0x40] sm:$0xff] (%p103_p2)  ;;  %v1725_v54 = vld [vmem:[#allocation2 + $0x50] sm:$0xff] (%p103_p2) }
 0x1d0   : > { %1695 = vst.msk [vmem:[#allocation2 + $0x60] sm:$0xff] %vm51_vm0, %v1679_v43  ;;  %v1680_v29 = vmul.f32 %v2698_v53, %v2692_v21  ;;  %v1726_v18 = vld [vmem:[#allocation2 + $0x58] sm:$0xff] (%p103_p2) }
 0x1d1   : > { %1698 = vst.msk [vmem:[#allocation2 + $0x78] sm:$0xff] %vm51_vm0, %v1682_v57  ;;  %1814 = vperm.xlu1 (%p103_p2), %2700, %v1744_v13   ;;  %1809 = vperm.xlu0 (%p103_p2), %2699, %v1743_v14   ;;  %v1724_v30 = vld [vmem:[#allocation2 + $0x48] sm:$0xff] (%p103_p2) }
 0x1d2   : > { %1696 = vst.msk [vmem:[#allocation2 + $0x68] sm:$0xff] %vm51_vm0, %v1680_v29 }
 0x1d5   :  { %1824 = vperm.xlu1 %2700, %v1746_v15   ;;  %1819 = vperm.xlu0 %2699, %v1745_v16   ;;  %v1729_v15 = vld [vmem:[#allocation2 + $0x70] sm:$0xff] }
 0x1d7   :  { %v1727_v5 = vld [vmem:[#allocation2 + $0x60] sm:$0xff] }
 0x1d9   :  { %v1728_v10 = vld [vmem:[#allocation2 + $0x68] sm:$0xff] }
 0x238   :  { %v1760_v17 = vpop.permute.xlu1 %1759  ;;  %v1750_v34 = vpop.permute.xlu0 %1749 }
 0x239   :  { %v1827_v33 = vmul.f32 %v1750_v34, %v1715_v39  ;;  %v1829_v31 = vmul.f32 %v1760_v17, %v1717_v59  ;;  %v1730_v59 = vld [vmem:[#allocation2 + $0x78] sm:$0xff] }
 0x23b   :  { %v1843_v51 = vsel %vm51_vm0, %v1827_v33, 0.0  ;;  %v1846_v28 = vsel %vm51_vm0, %v1829_v31, 0.0 }
 0x23c   :  { %v1765_v24 = vpop.permute.xlu1 %1764  ;;  %v1755_v46 = vpop.permute.xlu0 %1754 }
 0x23d   :  { %v1828_v44 = vmul.f32 %v1755_v46, %v1716_v50  ;;  %v1830_v35 = vmul.f32 %v1765_v24, %v1718_v3 }
 0x23f   :  { %v1844_v49 = vsel %vm51_vm0, %v1828_v44, 0.0  ;;  %v1848_v48 = vsel %vm51_vm0, %v1830_v35, 0.0 }
 0x240   :  { %v1845_v38 = vadd.f32 %v1844_v49, %v1843_v51  ;;  %v1775_v42 = vpop.permute.xlu1 %1774  ;;  %v1770_v32 = vpop.permute.xlu0 %1769 }
 0x241   :  { %v1831_v56 = vmul.f32 %v1770_v32, %v1719_v37  ;;  %v1832_v1 = vmul.f32 %v1775_v42, %v1720_v19 }
 0x242   :  { %v1847_v58 = vadd.f32 %v1846_v28, %v1845_v38 }
 0x243   :  { %v1850_v63 = vsel %vm51_vm0, %v1831_v56, 0.0  ;;  %v1852_v25 = vsel %vm51_vm0, %v1832_v1, 0.0  ;;  %v1881_v56 = vstv %s1880_s3 }
 0x244   :  { %v1849_v47 = vadd.f32 %v1848_v48, %v1847_v58  ;;  %v1785_v23 = vpop.permute.xlu1 %1784  ;;  %v1780_v45 = vpop.permute.xlu0 %1779 }
 0x245   :  { %v1833_v52 = vmul.f32 %v1780_v45, %v1721_v26  ;;  %v1834_v61 = vmul.f32 %v1785_v23, %v1722_v36 }
 0x246   :  { %v1851_v20 = vadd.f32 %v1850_v63, %v1849_v47 }
 0x247   :  { %v1854_v22 = vsel %vm51_vm0, %v1833_v52, 0.0  ;;  %v1856_v43 = vsel %vm51_vm0, %v1834_v61, 0.0 }
 0x248   :  { %v1853_v60 = vadd.f32 %v1852_v25, %v1851_v20  ;;  %v1795_v27 = vpop.permute.xlu1 %1794  ;;  %v1790_v62 = vpop.permute.xlu0 %1789 }
 0x249   :  { %v1835_v21 = vmul.f32 %v1790_v62, %v1723_v0  ;;  %v1836_v53 = vmul.f32 %v1795_v27, %v1724_v30 }
 0x24a   :  { %v1855_v2 = vadd.f32 %v1854_v22, %v1853_v60 }
 0x24b   :  { %v1858_v40 = vsel %vm51_vm0, %v1835_v21, 0.0  ;;  %v1860_v6 = vsel %vm51_vm0, %v1836_v53, 0.0 }
 0x24c   :  { %v1857_v57 = vadd.f32 %v1856_v43, %v1855_v2  ;;  %v1805_v29 = vpop.permute.xlu1 %1804  ;;  %v1800_v41 = vpop.permute.xlu0 %1799 }
 0x24d   :  { %v1837_v55 = vmul.f32 %v1800_v41, %v1725_v54  ;;  %v1838_v7 = vmul.f32 %v1805_v29, %v1726_v18 }
 0x24e   :  { %v1859_v4 = vadd.f32 %v1858_v40, %v1857_v57 }
 0x24f   :  { %v1862_v12 = vsel %vm51_vm0, %v1837_v55, 0.0  ;;  %v1864_v16 = vsel %vm51_vm0, %v1838_v7, 0.0 }
 0x250   :  { %v1861_v8 = vadd.f32 %v1860_v6, %v1859_v4  ;;  %v1815_v9 = vpop.permute.xlu1 %1814  ;;  %v1810_v11 = vpop.permute.xlu0 %1809 }
 0x251   :  { %v1839_v13 = vmul.f32 %v1810_v11, %v1727_v5  ;;  %v1840_v17 = vmul.f32 %v1815_v9, %v1728_v10 }
 0x252   :  { %v1863_v14 = vadd.f32 %v1862_v12, %v1861_v8 }
 0x253   :  { %v1866_v33 = vsel %vm51_vm0, %v1839_v13, 0.0  ;;  %v1868_v46 = vsel %vm51_vm0, %v1840_v17, 0.0 }
 0x254   :  { %v1865_v34 = vadd.f32 %v1864_v16, %v1863_v14  ;;  %v1825_v39 = vpop.permute.xlu1 %1824  ;;  %v1820_v50 = vpop.permute.xlu0 %1819 }
 0x255   :  { %v1841_v24 = vmul.f32 %v1820_v50, %v1729_v15  ;;  %v1842_v31 = vmul.f32 %v1825_v39, %v1730_v59 }
 0x256   :  { %v1867_v3 = vadd.f32 %v1866_v33, %v1865_v34 }
 0x257   :  { %v1870_v37 = vsel %vm51_vm0, %v1841_v24, 0.0  ;;  %v1872_v35 = vsel %vm51_vm0, %v1842_v31, 0.0 }
 0x258   :  { %v1869_v44 = vadd.f32 %v1868_v46, %v1867_v3 }
 0x25a   :  { %v1871_v51 = vadd.f32 %v1870_v37, %v1869_v44 }
 0x25c   :  { %v1873_v49 = vadd.f32 %v1872_v35, %v1871_v51 }
 0x25e   :  { %v1874_v38 = vrot.slane %v1873_v49, 4 }
 0x260   :  { %v1875_v42 = vadd.f32 %v1874_v38, %v1873_v49 }
 0x262   :  { %v1876_v19 = vrot.slane %v1875_v42, 2 }
 0x264   :  { %v1877_v32 = vadd.f32 %v1876_v19, %v1875_v42 }
 0x266   :  { %v1878_v28 = vrot.slane %v1877_v32, 1 }
 0x268   :  { %v1879_v58 = vadd.f32 %v1878_v28, %v1877_v32 }
 0x26a   :  { %v1882_v26 = vadd.f32 %v1881_v56, %v1879_v58 }
 0x26c   :  { %v2058_v48 = vmul.f32 -1.442695, %v1882_v26 }
 0x26e   :  { %2701 = vpow2.f32 %v2058_v48 }
 0x278   :  { %v2702_v1 = vpop.eup %2701 }
 0x279   :  { %v1886_v47 = vadd.f32 1.0, %v2702_v1 }
 0x27b   :  { %2703 = vrcp.f32 %v1886_v47 }
 0x285   :  { %v2704_v23 = vpop.eup %2703 }
 0x286   :  { %1890 = vst.msk [vmem:[#allocation10] sm:$0x1] %vm1889_vm10, %v2704_v23 }
 0x287   :  { %2760 = shalt.err (!%p2757_p7)
}
 0x288   :  { %s2761_s29 = scalar_lea.hbm %s3281_s5, 16 }
 0x289   :  { %p2762_p8 = scmp.ne.s32.totalorder %s3281_s5, %s2761_s29  ;;  %p2765_p9 = scmp.lt.u32.totalorder %s2761_s29, %s3281_s5 }
 0x28b   :  { %p2767_p10 = pnand %p2765_p9, %p2762_p8 }
 0x28d   :  { %2770 = shalt.err (!%p2767_p10)
}
 0x28e   :  { %1900 = dma.vmem_to_hbm [thread:$0]  %s1898_s26, 16, %s3281_s5, [#allocation7]  }
 0x28f   :  { %2779 = dma.done.wait [#allocation7], 16  }
 0x290   :  { %2780 = vsyncadd [#allocation7], 4294967280 }
 0x291   :  { %1904 = vsyncpa [#allocation6], 1 }
 0x292   :  { %1905 = vsyncpa [#allocation9], 1 }
 0x293   :  { %1906 = vsyncpa [#allocation7], 1 }

</bundles_post_ra>
